<compile_context>
chip_gen: v7x
topology: tpu7x:2x2x1
jax: 0.10.0
libtpu: 0.0.40
codegen_flags: <defaults>
</compile_context>

<pallas_src>
import functools
import math

import numpy as np
import jax
import jax.numpy as jnp
from jax import lax
from jax.experimental import pallas as pl
from jax.experimental.pallas import tpu as pltpu


# ----------------------------------------------------------------------------------
# Fused kernel: whole forward for one batch element (incl. Performer q'/k')
# ----------------------------------------------------------------------------------

def _fused_forward_kernel(z_ref, feat_ref, wqkT_ref, bqk_ref, projbd_ref, ediag_ref,
                          wvT_ref, bv_ref, eblk_ref, woT_ref, bo_ref,
                          ln_g_ref, ln_b_ref, pbias_ref, w2T_ref, b2_ref,
                          out_ref, *, num_layers, heads, d, m, tau):
    """One grid step = one batch element; nothing leaves VMEM.

    z_ref    : (1, N, H)                  embedding rows for this batch element
    feat_ref : (N, H)                     node features (batch-invariant)
    wqkT     : (L, H, 2*heads*d)          [Wq^T | Wk^T], head-major columns
    bqk      : (L, 1, 2*heads*d)
    projbd   : (L, 2*heads*d, 2*heads*M)  kron(I_{2*heads}, proj^T) per layer
    ediag    : (2*heads*d, 2*heads*M)     0.5 * kron(I_{2*heads}, ones(d, M))
    wvT      : (L, H, heads*d)            bv: (L, 1, heads*d)
    eblk     : (heads*M, heads*d)         kron(I_heads, ones(M, d))
    woT      : (L, heads*d, H)            bo: (L, 1, H)
    ln_g/b   : (L+1, 1, H)                pbias: (N, H)
    w2T      : (H, out_ch)                b2: (1, out_ch)
    out_ref  : (1, 1, 128)                per-element scalar broadcast across lanes
    """
    N = feat_ref.shape[0]
    eps = 1e-6
    scale = (1.0 / math.sqrt(tau)) * (float(d) ** -0.25)   # (1/sqrt(tau)) * d**-1/4
    ratio = float(m) ** -0.5                               # 1/sqrt(nb_random_features)

    def layer_norm(x, g, b):
        mu = jnp.mean(x, axis=-1, keepdims=True)
        var = jnp.mean(jnp.square(x - mu), axis=-1, keepdims=True)
        return (x - mu) * jax.lax.rsqrt(var + 1e-5) * g + b

    feat = feat_ref[...]
    pbias = pbias_ref[...]
    ediag = ediag_ref[...]
    eblk = eblk_ref[...]

    # bns[0] + ReLU (dropout p=0 / eval => identity)
    z = jnp.maximum(layer_norm(z_ref[0], ln_g_ref[0], ln_b_ref[0]), 0.0)       # (N, H)
    layer_prev = z

    for l in range(num_layers):                                    # L = 2, unrolled
        # --- Performer features q'/k' for all heads at once (lane-dense) ---
        qk = (jnp.dot(feat, wqkT_ref[l], preferred_element_type=jnp.float32)
              + bqk_ref[l]) * scale                                # (N, 2*heads*d)
        dash = jnp.dot(qk, projbd_ref[l],
                       preferred_element_type=jnp.float32)         # (N, 2*heads*M)
        diag = jnp.dot(qk * qk, ediag,
                       preferred_element_type=jnp.float32)         # (N, 2*heads*M)
        # Stability offsets: per-row per-head max for queries, per-head global max
        # over (N, M) for keys (NodeFormer softmax_kernel_transformation semantics).
        dash3 = dash.reshape(N, 2 * heads, m)
        row_max = jnp.max(dash3, axis=-1, keepdims=True)           # (N, 2*heads, 1)
        glob_max = jnp.max(row_max, axis=0, keepdims=True)         # (1, 2*heads, 1)
        is_q = lax.broadcasted_iota(jnp.int32, (N, 2 * heads, m), 1) < heads
        stab = jnp.where(is_q, row_max, glob_max).reshape(N, 2 * heads * m)
        qk_prime = ratio * (jnp.exp(dash - diag - stab) + eps)     # (N, 2*heads*M)
        q_p = qk_prime[:, : heads * m]                             # (N, heads*M)
        k_p = qk_prime[:, heads * m:]                              # (N, heads*M)

        # --- kernelized attention, all heads at once (cross-head blocks masked) ---
        v = (jnp.dot(z, wvT_ref[l], preferred_element_type=jnp.float32)
             + bv_ref[l])                                          # (N, heads*d)
        kv = lax.dot_general(k_p, v, (((0,), (0,)), ((), ())),
                             preferred_element_type=jnp.float32)   # (heads*M, heads*d)
        num = jnp.dot(q_p, kv * eblk,
                      preferred_element_type=jnp.float32)          # (N, heads*d)
        ks = jnp.sum(k_p, axis=0, keepdims=True)                   # (1, heads*M)
        den = jnp.dot(q_p * ks, eblk,
                      preferred_element_type=jnp.float32)          # (N, heads*d)
        o = num * pl.reciprocal(den, approx=False)                 # (N, heads*d)

        # --- Wo (single K=128 matmul) + prefer_bias + residual + LayerNorm ---
        z_mp = jnp.dot(o, woT_ref[l], preferred_element_type=jnp.float32) + bo_ref[l]
        z = layer_norm(z_mp + pbias + layer_prev, ln_g_ref[l + 1], ln_b_ref[l + 1])
        layer_prev = z                                             # use_act=False

    # --- fc2 + ReLU + sum over all (N, out_ch) elements of this batch element ---
    y = jnp.dot(z, w2T_ref[...], preferred_element_type=jnp.float32) + b2_ref[...]
    total = jnp.sum(jnp.maximum(y, 0.0))
    out_ref[...] = jnp.zeros(out_ref.shape, jnp.float32) + total   # lane-dense store


def multiinf_surrogate_forward(params, inf_state, adj, *, tau=1.0):
    # `adj` accepted for API parity; unused in eval mode (rb_order=0, no edge loss).
    del adj
    z_emb = jnp.take(params["infemb"], inf_state, axis=0)          # (B, N, H)
    B, N, H = z_emb.shape
    L = params["WqkT"].shape[0]
    d = H                                                          # out_ch per head
    heads = params["WvT"].shape[-1] // d
    m = params["Eblk"].shape[0] // heads
    LANES = 128

    def full_spec(arr):
        zeros = (0,) * arr.ndim
        return pl.BlockSpec(arr.shape, lambda b, _z=zeros: _z)

    kern = functools.partial(_fused_forward_kernel, num_layers=L, heads=heads,
                             d=d, m=m, tau=float(tau))
    # NOTE: all weight/feature blocks are loaded whole per grid step (<1 MiB total).
    # For real graph sizes, add an N-tiling grid axis + vmem_limit_bytes.
    out = pl.pallas_call(
        kern,
        out_shape=jax.ShapeDtypeStruct((B, 1, LANES), jnp.float32),
        grid=(B,),
        in_specs=[
            pl.BlockSpec((1, N, H), lambda b: (b, 0, 0)),          # per-batch embedding
            full_spec(params["node_feats"]),
            full_spec(params["WqkT"]), full_spec(params["bqk"]),
            full_spec(params["ProjBD"]), full_spec(params["Ediag"]),
            full_spec(params["WvT"]), full_spec(params["bv"]),
            full_spec(params["Eblk"]),
            full_spec(params["WoT"]), full_spec(params["bo"]),
            full_spec(params["ln_gamma"]), full_spec(params["ln_beta"]),
            full_spec(params["prefer_bias"]),
            full_spec(params["W2T"]), full_spec(params["b2"]),
        ],
        out_specs=pl.BlockSpec((1, 1, LANES), lambda b: (b, 0, 0)),
        compiler_params=pltpu.CompilerParams(dimension_semantics=("parallel",)),
    )(z_emb, params["node_feats"], params["WqkT"], params["bqk"], params["ProjBD"],
      params["Ediag"], params["WvT"], params["bv"], params["Eblk"], params["WoT"],
      params["bo"], params["ln_gamma"], params["ln_beta"], params["prefer_bias"],
      params["W2T"], params["b2"])
    return out[:, 0, 0]


# ----------------------------------------------------------------------------------
# Parameters: pre-transposed, head-packed, block-diagonal constants built at init
# ----------------------------------------------------------------------------------

def make_projection_matrix(m, d, seed):
    """Performer create_projection_matrix (orthogonal Gaussian features, scaling=0)."""
    # TODO(synk): the PyTorch code seeds torch's RNG with ceil(|sum(query)|*1e8); that
    # data-dependent torch RNG stream cannot be reproduced in JAX, so a fixed
    # deterministic seed per layer is used instead.
    rng = np.random.default_rng(seed)
    nb_full_blocks = m // d
    blocks = []
    for _ in range(nb_full_blocks):
        g = rng.standard_normal((d, d))
        q, _ = np.linalg.qr(g)
        blocks.append(q.T)
    rem = m - nb_full_blocks * d
    if rem > 0:
        g = rng.standard_normal((d, d))
        q, _ = np.linalg.qr(g)
        blocks.append(q.T[:rem])
    final = np.concatenate(blocks, axis=0)                          # (m, d)
    multiplier = np.linalg.norm(rng.standard_normal((m, d)), axis=1)
    return (multiplier[:, None] * final).astype(np.float32)         # (m, d)


def init_params(key, n, item_num, hidden, out_ch, num_layers, num_heads,
                nb_random_features, proj_seed=1234):
    H = hidden
    d = hidden                        # out_channels per head == hidden_channels
    heads = num_heads
    m = nb_random_features
    keys = iter(jax.random.split(key, 8 * num_layers + 8))

    def lin(in_f, out_f):             # torch nn.Linear default init
        bound = 1.0 / math.sqrt(in_f)
        w = jax.random.uniform(next(keys), (out_f, in_f), jnp.float32, -bound, bound)
        b = jax.random.uniform(next(keys), (out_f,), jnp.float32, -bound, bound)
        return w, b

    emb = jax.random.normal(next(keys), (item_num, H), jnp.float32)
    emb = emb.at[0].set(0.0)                           # infemb.weight.data[0].fill_(0)
    node_feats = jax.random.normal(next(keys), (n, H), jnp.float32)

    wqkT, bqk, wvT, bv, woT, bo, projbd = [], [], [], [], [], [], []
    for li in range(num_layers):
        wq, bq_ = lin(H, d * heads)
        wk, bk_ = lin(H, d * heads)
        wv, bv_ = lin(H, d * heads)
        wo, bo_ = lin(d * heads, H)
        # torch does y = x @ W.T; W.T columns are already head-major (h, d), matching
        # .reshape(-1, N, heads, d) and .flatten(-2, -1) — no per-head splitting needed.
        wqkT.append(jnp.concatenate([wq.T, wk.T], axis=1))          # (H, 2*heads*d)
        bqk.append(jnp.concatenate([bq_, bk_]).reshape(1, 2 * heads * d))
        wvT.append(wv.T)                                            # (H, heads*d)
        bv.append(bv_.reshape(1, heads * d))
        woT.append(wo.T)                                            # (heads*d, H)
        bo.append(bo_.reshape(1, H))
        projT = make_projection_matrix(m, d, seed=proj_seed + li).T  # (d, m)
        projbd.append(np.kron(np.eye(2 * heads, dtype=np.float32), projT))

    w2, b2 = lin(H, out_ch)
    eye2h = np.eye(2 * heads, dtype=np.float32)
    eyeh = np.eye(heads, dtype=np.float32)
    params = {
        "infemb": emb,
        "node_feats": node_feats,
        "prefer_bias": jnp.zeros((n, H), jnp.float32),
        "ln_gamma": jnp.ones((num_layers + 1, 1, H), jnp.float32),
        "ln_beta": jnp.zeros((num_layers + 1, 1, H), jnp.float32),
        "WqkT": jnp.stack(wqkT), "bqk": jnp.stack(bqk),
        "WvT": jnp.stack(wvT), "bv": jnp.stack(bv),
        "WoT": jnp.stack(woT), "bo": jnp.stack(bo),
        "W2T": w2.T, "b2": b2.reshape(1, out_ch),
        # Block-diagonal / block-ones constants for head-packed lane-dense math.
        "ProjBD": jnp.asarray(np.stack(projbd), jnp.float32),        # (L, 2hd, 2hM)
        "Ediag": jnp.asarray(
            0.5 * np.kron(eye2h, np.ones((d, m), np.float32)), jnp.float32),  # (2hd, 2hM)
        "Eblk": jnp.asarray(
            np.kron(eyeh, np.ones((m, d), np.float32)), jnp.float32),         # (hM, hd)
    }
    return params


# ----------------------------------------------------------------------------------
# Main
# ----------------------------------------------------------------------------------

if __name__ == "__main__":
    N_NODES = 8              # graph size n (== sequence length N)
    ITEM_NUM = 6
    HIDDEN = 32
    OUT_CH = 4
    NUM_LAYERS = 2
    NUM_HEADS = 4            # heads * hidden = 128  -> lane-dense packed head dim
    NB_RANDOM_FEATURES = 16  # 2 * heads * M = 128   -> lane-dense feature dim
    BATCH = 2
    TAU = 1.0

    key = jax.random.PRNGKey(0)
    k_params, k_inp = jax.random.split(key)

    params = init_params(k_params, N_NODES, ITEM_NUM, HIDDEN, OUT_CH,
                         NUM_LAYERS, NUM_HEADS, NB_RANDOM_FEATURES)
    inf_state = jax.random.randint(k_inp, (BATCH, N_NODES), 0, ITEM_NUM)
    adj = jnp.zeros((2, 1), dtype=jnp.int32)   # placeholder edge_index (unused in eval)

    fwd = jax.jit(functools.partial(multiinf_surrogate_forward, tau=TAU))
    out = jax.block_until_ready(fwd(params, inf_state, adj))

    assert out.shape == (BATCH,)
    assert bool(jnp.all(jnp.isfinite(out)))
    print("KERNEL_OK")
</pallas_src>

<mosaic_0001>
module attributes {stable_mosaic.version = 11 : i64} {
  func.func @_fused_forward_kernel(%arg0: i32, %arg1: memref<1x8x32xf32, #tpu.memory_space<vmem>>, %arg2: memref<8x32xf32, #tpu.memory_space<vmem>>, %arg3: memref<2x32x256xf32, #tpu.memory_space<vmem>>, %arg4: memref<2x1x256xf32, #tpu.memory_space<vmem>>, %arg5: memref<2x256x128xf32, #tpu.memory_space<vmem>>, %arg6: memref<256x128xf32, #tpu.memory_space<vmem>>, %arg7: memref<2x32x128xf32, #tpu.memory_space<vmem>>, %arg8: memref<2x1x128xf32, #tpu.memory_space<vmem>>, %arg9: memref<64x128xf32, #tpu.memory_space<vmem>>, %arg10: memref<2x128x32xf32, #tpu.memory_space<vmem>>, %arg11: memref<2x1x32xf32, #tpu.memory_space<vmem>>, %arg12: memref<3x1x32xf32, #tpu.memory_space<vmem>>, %arg13: memref<3x1x32xf32, #tpu.memory_space<vmem>>, %arg14: memref<8x32xf32, #tpu.memory_space<vmem>>, %arg15: memref<32x4xf32, #tpu.memory_space<vmem>>, %arg16: memref<1x4xf32, #tpu.memory_space<vmem>>, %arg17: memref<1x1x128xf32, #tpu.memory_space<vmem>>) attributes {dimension_semantics = [#tpu.dimension_semantics<parallel>], iteration_bounds = array<i64: 2>, scalar_prefetch = 0 : i64, scratch_operands = 0 : i64, tpu.core_type = #tpu.core_type<tc>, window_params = [{transform_indices = @transform_0, window_bounds = array<i64: 1, 8, 32>}, {pipeline_mode = #tpu.pipeline_mode<synchronous>, transform_indices = @transform_1, window_bounds = array<i64: 8, 32>}, {pipeline_mode = #tpu.pipeline_mode<synchronous>, transform_indices = @transform_2, window_bounds = array<i64: 2, 32, 256>}, {pipeline_mode = #tpu.pipeline_mode<synchronous>, transform_indices = @transform_3, window_bounds = array<i64: 2, 1, 256>}, {pipeline_mode = #tpu.pipeline_mode<synchronous>, transform_indices = @transform_4, window_bounds = array<i64: 2, 256, 128>}, {pipeline_mode = #tpu.pipeline_mode<synchronous>, transform_indices = @transform_5, window_bounds = array<i64: 256, 128>}, {pipeline_mode = #tpu.pipeline_mode<synchronous>, transform_indices = @transform_6, window_bounds = array<i64: 2, 32, 128>}, {pipeline_mode = #tpu.pipeline_mode<synchronous>, transform_indices = @transform_7, window_bounds = array<i64: 2, 1, 128>}, {pipeline_mode = #tpu.pipeline_mode<synchronous>, transform_indices = @transform_8, window_bounds = array<i64: 64, 128>}, {pipeline_mode = #tpu.pipeline_mode<synchronous>, transform_indices = @transform_9, window_bounds = array<i64: 2, 128, 32>}, {pipeline_mode = #tpu.pipeline_mode<synchronous>, transform_indices = @transform_10, window_bounds = array<i64: 2, 1, 32>}, {pipeline_mode = #tpu.pipeline_mode<synchronous>, transform_indices = @transform_11, window_bounds = array<i64: 3, 1, 32>}, {pipeline_mode = #tpu.pipeline_mode<synchronous>, transform_indices = @transform_12, window_bounds = array<i64: 3, 1, 32>}, {pipeline_mode = #tpu.pipeline_mode<synchronous>, transform_indices = @transform_13, window_bounds = array<i64: 8, 32>}, {pipeline_mode = #tpu.pipeline_mode<synchronous>, transform_indices = @transform_14, window_bounds = array<i64: 32, 4>}, {pipeline_mode = #tpu.pipeline_mode<synchronous>, transform_indices = @transform_15, window_bounds = array<i64: 1, 4>}, {transform_indices = @transform_16, window_bounds = array<i64: 1, 1, 128>}]} {
    %c0 = arith.constant 0 : index
    %c0_0 = arith.constant 0 : index
    %0 = vector.load %arg2[%c0, %c0_0] : memref<8x32xf32, #tpu.memory_space<vmem>>, vector<8x32xf32>
    %c0_1 = arith.constant 0 : index
    %c0_2 = arith.constant 0 : index
    %1 = vector.load %arg14[%c0_1, %c0_2] : memref<8x32xf32, #tpu.memory_space<vmem>>, vector<8x32xf32>
    %c0_3 = arith.constant 0 : index
    %c0_4 = arith.constant 0 : index
    %2 = vector.load %arg6[%c0_3, %c0_4] : memref<256x128xf32, #tpu.memory_space<vmem>>, vector<256x128xf32>
    %c0_5 = arith.constant 0 : index
    %c0_6 = arith.constant 0 : index
    %3 = vector.load %arg9[%c0_5, %c0_6] : memref<64x128xf32, #tpu.memory_space<vmem>>, vector<64x128xf32>
    %c0_7 = arith.constant 0 : index
    %c0_8 = arith.constant 0 : index
    %c0_9 = arith.constant 0 : index
    %4 = vector.load %arg1[%c0_7, %c0_8, %c0_9] : memref<1x8x32xf32, #tpu.memory_space<vmem>>, vector<1x8x32xf32>
    %5 = vector.shape_cast %4 : vector<1x8x32xf32> to vector<8x32xf32>
    %c0_10 = arith.constant 0 : index
    %c0_11 = arith.constant 0 : index
    %c0_12 = arith.constant 0 : index
    %6 = vector.load %arg12[%c0_10, %c0_11, %c0_12] : memref<3x1x32xf32, #tpu.memory_space<vmem>>, vector<1x1x32xf32>
    %7 = vector.shape_cast %6 : vector<1x1x32xf32> to vector<1x32xf32>
    %c0_13 = arith.constant 0 : index
    %c0_14 = arith.constant 0 : index
    %c0_15 = arith.constant 0 : index
    %8 = vector.load %arg13[%c0_13, %c0_14, %c0_15] : memref<3x1x32xf32, #tpu.memory_space<vmem>>, vector<1x1x32xf32>
    %9 = vector.shape_cast %8 : vector<1x1x32xf32> to vector<1x32xf32>
    %cst = arith.constant dense<0.000000e+00> : vector<8xf32>
    %10 = vector.multi_reduction <add>, %5, %cst [1] : vector<8x32xf32> to vector<8xf32>
    %11 = vector.shape_cast %10 : vector<8xf32> to vector<8x1xf32>
    %cst_16 = arith.constant 3.200000e+01 : f32
    %12 = vector.broadcast %cst_16 : f32 to vector<8x1xf32>
    %13 = arith.divf %11, %12 : vector<8x1xf32>
    %14 = vector.broadcast %13 : vector<8x1xf32> to vector<8x32xf32>
    %15 = arith.subf %5, %14 : vector<8x32xf32>
    %16 = arith.mulf %15, %15 : vector<8x32xf32>
    %cst_17 = arith.constant dense<0.000000e+00> : vector<8xf32>
    %17 = vector.multi_reduction <add>, %16, %cst_17 [1] : vector<8x32xf32> to vector<8xf32>
    %18 = vector.shape_cast %17 : vector<8xf32> to vector<8x1xf32>
    %cst_18 = arith.constant 3.200000e+01 : f32
    %19 = vector.broadcast %cst_18 : f32 to vector<8x1xf32>
    %20 = arith.divf %18, %19 : vector<8x1xf32>
    %21 = vector.broadcast %13 : vector<8x1xf32> to vector<8x32xf32>
    %22 = arith.subf %5, %21 : vector<8x32xf32>
    %cst_19 = arith.constant 9.99999974E-6 : f32
    %23 = vector.broadcast %cst_19 : f32 to vector<8x1xf32>
    %24 = arith.addf %20, %23 : vector<8x1xf32>
    %25 = math.rsqrt %24 : vector<8x1xf32>
    %26 = vector.broadcast %25 : vector<8x1xf32> to vector<8x32xf32>
    %27 = arith.mulf %22, %26 : vector<8x32xf32>
    %28 = vector.broadcast %7 : vector<1x32xf32> to vector<8x32xf32>
    %29 = arith.mulf %27, %28 : vector<8x32xf32>
    %30 = vector.broadcast %9 : vector<1x32xf32> to vector<8x32xf32>
    %31 = arith.addf %29, %30 : vector<8x32xf32>
    %cst_20 = arith.constant 0.000000e+00 : f32
    %32 = vector.broadcast %cst_20 : f32 to vector<8x32xf32>
    %33 = arith.maximumf %31, %32 : vector<8x32xf32>
    %c0_21 = arith.constant 0 : index
    %c0_22 = arith.constant 0 : index
    %c0_23 = arith.constant 0 : index
    %34 = vector.load %arg3[%c0_21, %c0_22, %c0_23] : memref<2x32x256xf32, #tpu.memory_space<vmem>>, vector<1x32x256xf32>
    %35 = vector.shape_cast %34 : vector<1x32x256xf32> to vector<32x256xf32>
    %cst_24 = arith.constant dense<0.000000e+00> : vector<8x256xf32>
    %36 = tpu.matmul %0, %35, %cst_24 {dimension_numbers = #tpu.dot_dimension_numbers<[1], [0], [0], [1], [0, 0, 1, 1], [], []>} : vector<8x32xf32>, vector<32x256xf32>, vector<8x256xf32> -> vector<8x256xf32>
    %c0_25 = arith.constant 0 : index
    %c0_26 = arith.constant 0 : index
    %c0_27 = arith.constant 0 : index
    %37 = vector.load %arg4[%c0_25, %c0_26, %c0_27] : memref<2x1x256xf32, #tpu.memory_space<vmem>>, vector<1x1x256xf32>
    %38 = vector.shape_cast %37 : vector<1x1x256xf32> to vector<1x256xf32>
    %39 = vector.broadcast %38 : vector<1x256xf32> to vector<8x256xf32>
    %40 = arith.addf %36, %39 : vector<8x256xf32>
    %cst_28 = arith.constant 0.420448214 : f32
    %41 = vector.broadcast %cst_28 : f32 to vector<8x256xf32>
    %42 = arith.mulf %40, %41 : vector<8x256xf32>
    %c0_29 = arith.constant 0 : index
    %c0_30 = arith.constant 0 : index
    %c0_31 = arith.constant 0 : index
    %43 = vector.load %arg5[%c0_29, %c0_30, %c0_31] : memref<2x256x128xf32, #tpu.memory_space<vmem>>, vector<1x256x128xf32>
    %44 = vector.shape_cast %43 : vector<1x256x128xf32> to vector<256x128xf32>
    %cst_32 = arith.constant dense<0.000000e+00> : vector<8x128xf32>
    %45 = tpu.matmul %42, %44, %cst_32 {dimension_numbers = #tpu.dot_dimension_numbers<[1], [0], [0], [1], [0, 0, 1, 1], [], []>} : vector<8x256xf32>, vector<256x128xf32>, vector<8x128xf32> -> vector<8x128xf32>
    %46 = arith.mulf %42, %42 : vector<8x256xf32>
    %cst_33 = arith.constant dense<0.000000e+00> : vector<8x128xf32>
    %47 = tpu.matmul %46, %2, %cst_33 {dimension_numbers = #tpu.dot_dimension_numbers<[1], [0], [0], [1], [0, 0, 1, 1], [], []>} : vector<8x256xf32>, vector<256x128xf32>, vector<8x128xf32> -> vector<8x128xf32>
    %48 = vector.shape_cast %45 : vector<8x128xf32> to vector<8x8x16xf32>
    %cst_34 = arith.constant dense<0xFF800000> : vector<8x8xf32>
    %49 = vector.multi_reduction <maximumf>, %48, %cst_34 [2] : vector<8x8x16xf32> to vector<8x8xf32>
    %50 = vector.shape_cast %49 : vector<8x8xf32> to vector<8x8x1xf32>
    %cst_35 = arith.constant dense<0xFF800000> : vector<8x1xf32>
    %51 = vector.multi_reduction <maximumf>, %50, %cst_35 [0] : vector<8x8x1xf32> to vector<8x1xf32>
    %52 = vector.shape_cast %51 : vector<8x1xf32> to vector<1x8x1xf32>
    %53 = tpu.iota {dimensions = array<i32: 1>} : vector<8x8x16xi32>
    %c4_i32 = arith.constant 4 : i32
    %54 = vector.broadcast %c4_i32 : i32 to vector<8x8x16xi32>
    %55 = arith.cmpi slt, %53, %54 : vector<8x8x16xi32>
    %56 = vector.shape_cast %50 : vector<8x8x1xf32> to vector<8x8x1xf32>
    %57 = vector.broadcast %56 : vector<8x8x1xf32> to vector<8x8x16xf32>
    %58 = vector.shape_cast %52 : vector<1x8x1xf32> to vector<1x8x1xf32>
    %59 = vector.broadcast %58 : vector<1x8x1xf32> to vector<8x8x16xf32>
    %60 = arith.select %55, %57, %59 : vector<8x8x16xi1>, vector<8x8x16xf32>
    %61 = vector.shape_cast %60 : vector<8x8x16xf32> to vector<8x128xf32>
    %62 = arith.subf %45, %47 : vector<8x128xf32>
    %63 = arith.subf %62, %61 : vector<8x128xf32>
    %64 = math.exp %63 : vector<8x128xf32>
    %cst_36 = arith.constant 9.99999997E-7 : f32
    %65 = vector.broadcast %cst_36 : f32 to vector<8x128xf32>
    %66 = arith.addf %64, %65 : vector<8x128xf32>
    %cst_37 = arith.constant 2.500000e-01 : f32
    %67 = vector.broadcast %cst_37 : f32 to vector<8x128xf32>
    %68 = arith.mulf %67, %66 : vector<8x128xf32>
    %69 = vector.extract_strided_slice %68 {offsets = [0, 0], sizes = [8, 64], strides = [1, 1]} : vector<8x128xf32> to vector<8x64xf32>
    %70 = vector.extract_strided_slice %68 {offsets = [0, 64], sizes = [8, 64], strides = [1, 1]} : vector<8x128xf32> to vector<8x64xf32>
    %c0_38 = arith.constant 0 : index
    %c0_39 = arith.constant 0 : index
    %c0_40 = arith.constant 0 : index
    %71 = vector.load %arg7[%c0_38, %c0_39, %c0_40] : memref<2x32x128xf32, #tpu.memory_space<vmem>>, vector<1x32x128xf32>
    %72 = vector.shape_cast %71 : vector<1x32x128xf32> to vector<32x128xf32>
    %cst_41 = arith.constant dense<0.000000e+00> : vector<8x128xf32>
    %73 = tpu.matmul %33, %72, %cst_41 {dimension_numbers = #tpu.dot_dimension_numbers<[1], [0], [0], [1], [0, 0, 1, 1], [], []>} : vector<8x32xf32>, vector<32x128xf32>, vector<8x128xf32> -> vector<8x128xf32>
    %c0_42 = arith.constant 0 : index
    %c0_43 = arith.constant 0 : index
    %c0_44 = arith.constant 0 : index
    %74 = vector.load %arg8[%c0_42, %c0_43, %c0_44] : memref<2x1x128xf32, #tpu.memory_space<vmem>>, vector<1x1x128xf32>
    %75 = vector.shape_cast %74 : vector<1x1x128xf32> to vector<1x128xf32>
    %76 = vector.broadcast %75 : vector<1x128xf32> to vector<8x128xf32>
    %77 = arith.addf %73, %76 : vector<8x128xf32>
    %cst_45 = arith.constant dense<0.000000e+00> : vector<64x128xf32>
    %78 = tpu.matmul %70, %77, %cst_45 {dimension_numbers = #tpu.dot_dimension_numbers<[0], [0], [1], [1], [0, 1, 1, 1], [], []>} : vector<8x64xf32>, vector<8x128xf32>, vector<64x128xf32> -> vector<64x128xf32>
    %79 = arith.mulf %78, %3 : vector<64x128xf32>
    %cst_46 = arith.constant dense<0.000000e+00> : vector<8x128xf32>
    %80 = tpu.matmul %69, %79, %cst_46 {dimension_numbers = #tpu.dot_dimension_numbers<[1], [0], [0], [1], [0, 0, 1, 1], [], []>} : vector<8x64xf32>, vector<64x128xf32>, vector<8x128xf32> -> vector<8x128xf32>
    %cst_47 = arith.constant dense<0.000000e+00> : vector<64xf32>
    %81 = vector.multi_reduction <add>, %70, %cst_47 [0] : vector<8x64xf32> to vector<64xf32>
    %82 = vector.shape_cast %81 : vector<64xf32> to vector<1x64xf32>
    %83 = vector.broadcast %82 : vector<1x64xf32> to vector<8x64xf32>
    %84 = arith.mulf %69, %83 : vector<8x64xf32>
    %cst_48 = arith.constant dense<0.000000e+00> : vector<8x128xf32>
    %85 = tpu.matmul %84, %3, %cst_48 {dimension_numbers = #tpu.dot_dimension_numbers<[1], [0], [0], [1], [0, 0, 1, 1], [], []>} : vector<8x64xf32>, vector<64x128xf32>, vector<8x128xf32> -> vector<8x128xf32>
    %86 = tpu.reciprocal %85 : vector<8x128xf32> -> vector<8x128xf32>
    %87 = arith.mulf %80, %86 : vector<8x128xf32>
    %c0_49 = arith.constant 0 : index
    %c0_50 = arith.constant 0 : index
    %c0_51 = arith.constant 0 : index
    %88 = vector.load %arg10[%c0_49, %c0_50, %c0_51] : memref<2x128x32xf32, #tpu.memory_space<vmem>>, vector<1x128x32xf32>
    %89 = vector.shape_cast %88 : vector<1x128x32xf32> to vector<128x32xf32>
    %cst_52 = arith.constant dense<0.000000e+00> : vector<8x32xf32>
    %90 = tpu.matmul %87, %89, %cst_52 {dimension_numbers = #tpu.dot_dimension_numbers<[1], [0], [0], [1], [0, 0, 1, 1], [], []>} : vector<8x128xf32>, vector<128x32xf32>, vector<8x32xf32> -> vector<8x32xf32>
    %c0_53 = arith.constant 0 : index
    %c0_54 = arith.constant 0 : index
    %c0_55 = arith.constant 0 : index
    %91 = vector.load %arg11[%c0_53, %c0_54, %c0_55] : memref<2x1x32xf32, #tpu.memory_space<vmem>>, vector<1x1x32xf32>
    %92 = vector.shape_cast %91 : vector<1x1x32xf32> to vector<1x32xf32>
    %93 = vector.broadcast %92 : vector<1x32xf32> to vector<8x32xf32>
    %94 = arith.addf %90, %93 : vector<8x32xf32>
    %95 = arith.addf %94, %1 : vector<8x32xf32>
    %96 = arith.addf %95, %33 : vector<8x32xf32>
    %c1 = arith.constant 1 : index
    %c0_56 = arith.constant 0 : index
    %c0_57 = arith.constant 0 : index
    %97 = vector.load %arg12[%c1, %c0_56, %c0_57] : memref<3x1x32xf32, #tpu.memory_space<vmem>>, vector<1x1x32xf32>
    %98 = vector.shape_cast %97 : vector<1x1x32xf32> to vector<1x32xf32>
    %c1_58 = arith.constant 1 : index
    %c0_59 = arith.constant 0 : index
    %c0_60 = arith.constant 0 : index
    %99 = vector.load %arg13[%c1_58, %c0_59, %c0_60] : memref<3x1x32xf32, #tpu.memory_space<vmem>>, vector<1x1x32xf32>
    %100 = vector.shape_cast %99 : vector<1x1x32xf32> to vector<1x32xf32>
    %cst_61 = arith.constant dense<0.000000e+00> : vector<8xf32>
    %101 = vector.multi_reduction <add>, %96, %cst_61 [1] : vector<8x32xf32> to vector<8xf32>
    %102 = vector.shape_cast %101 : vector<8xf32> to vector<8x1xf32>
    %cst_62 = arith.constant 3.200000e+01 : f32
    %103 = vector.broadcast %cst_62 : f32 to vector<8x1xf32>
    %104 = arith.divf %102, %103 : vector<8x1xf32>
    %105 = vector.broadcast %104 : vector<8x1xf32> to vector<8x32xf32>
    %106 = arith.subf %96, %105 : vector<8x32xf32>
    %107 = arith.mulf %106, %106 : vector<8x32xf32>
    %cst_63 = arith.constant dense<0.000000e+00> : vector<8xf32>
    %108 = vector.multi_reduction <add>, %107, %cst_63 [1] : vector<8x32xf32> to vector<8xf32>
    %109 = vector.shape_cast %108 : vector<8xf32> to vector<8x1xf32>
    %cst_64 = arith.constant 3.200000e+01 : f32
    %110 = vector.broadcast %cst_64 : f32 to vector<8x1xf32>
    %111 = arith.divf %109, %110 : vector<8x1xf32>
    %112 = vector.broadcast %104 : vector<8x1xf32> to vector<8x32xf32>
    %113 = arith.subf %96, %112 : vector<8x32xf32>
    %cst_65 = arith.constant 9.99999974E-6 : f32
    %114 = vector.broadcast %cst_65 : f32 to vector<8x1xf32>
    %115 = arith.addf %111, %114 : vector<8x1xf32>
    %116 = math.rsqrt %115 : vector<8x1xf32>
    %117 = vector.broadcast %116 : vector<8x1xf32> to vector<8x32xf32>
    %118 = arith.mulf %113, %117 : vector<8x32xf32>
    %119 = vector.broadcast %98 : vector<1x32xf32> to vector<8x32xf32>
    %120 = arith.mulf %118, %119 : vector<8x32xf32>
    %121 = vector.broadcast %100 : vector<1x32xf32> to vector<8x32xf32>
    %122 = arith.addf %120, %121 : vector<8x32xf32>
    %c1_66 = arith.constant 1 : index
    %c0_67 = arith.constant 0 : index
    %c0_68 = arith.constant 0 : index
    %123 = vector.load %arg3[%c1_66, %c0_67, %c0_68] : memref<2x32x256xf32, #tpu.memory_space<vmem>>, vector<1x32x256xf32>
    %124 = vector.shape_cast %123 : vector<1x32x256xf32> to vector<32x256xf32>
    %cst_69 = arith.constant dense<0.000000e+00> : vector<8x256xf32>
    %125 = tpu.matmul %0, %124, %cst_69 {dimension_numbers = #tpu.dot_dimension_numbers<[1], [0], [0], [1], [0, 0, 1, 1], [], []>} : vector<8x32xf32>, vector<32x256xf32>, vector<8x256xf32> -> vector<8x256xf32>
    %c1_70 = arith.constant 1 : index
    %c0_71 = arith.constant 0 : index
    %c0_72 = arith.constant 0 : index
    %126 = vector.load %arg4[%c1_70, %c0_71, %c0_72] : memref<2x1x256xf32, #tpu.memory_space<vmem>>, vector<1x1x256xf32>
    %127 = vector.shape_cast %126 : vector<1x1x256xf32> to vector<1x256xf32>
    %128 = vector.broadcast %127 : vector<1x256xf32> to vector<8x256xf32>
    %129 = arith.addf %125, %128 : vector<8x256xf32>
    %cst_73 = arith.constant 0.420448214 : f32
    %130 = vector.broadcast %cst_73 : f32 to vector<8x256xf32>
    %131 = arith.mulf %129, %130 : vector<8x256xf32>
    %c1_74 = arith.constant 1 : index
    %c0_75 = arith.constant 0 : index
    %c0_76 = arith.constant 0 : index
    %132 = vector.load %arg5[%c1_74, %c0_75, %c0_76] : memref<2x256x128xf32, #tpu.memory_space<vmem>>, vector<1x256x128xf32>
    %133 = vector.shape_cast %132 : vector<1x256x128xf32> to vector<256x128xf32>
    %cst_77 = arith.constant dense<0.000000e+00> : vector<8x128xf32>
    %134 = tpu.matmul %131, %133, %cst_77 {dimension_numbers = #tpu.dot_dimension_numbers<[1], [0], [0], [1], [0, 0, 1, 1], [], []>} : vector<8x256xf32>, vector<256x128xf32>, vector<8x128xf32> -> vector<8x128xf32>
    %135 = arith.mulf %131, %131 : vector<8x256xf32>
    %cst_78 = arith.constant dense<0.000000e+00> : vector<8x128xf32>
    %136 = tpu.matmul %135, %2, %cst_78 {dimension_numbers = #tpu.dot_dimension_numbers<[1], [0], [0], [1], [0, 0, 1, 1], [], []>} : vector<8x256xf32>, vector<256x128xf32>, vector<8x128xf32> -> vector<8x128xf32>
    %137 = vector.shape_cast %134 : vector<8x128xf32> to vector<8x8x16xf32>
    %cst_79 = arith.constant dense<0xFF800000> : vector<8x8xf32>
    %138 = vector.multi_reduction <maximumf>, %137, %cst_79 [2] : vector<8x8x16xf32> to vector<8x8xf32>
    %139 = vector.shape_cast %138 : vector<8x8xf32> to vector<8x8x1xf32>
    %cst_80 = arith.constant dense<0xFF800000> : vector<8x1xf32>
    %140 = vector.multi_reduction <maximumf>, %139, %cst_80 [0] : vector<8x8x1xf32> to vector<8x1xf32>
    %141 = vector.shape_cast %140 : vector<8x1xf32> to vector<1x8x1xf32>
    %142 = tpu.iota {dimensions = array<i32: 1>} : vector<8x8x16xi32>
    %c4_i32_81 = arith.constant 4 : i32
    %143 = vector.broadcast %c4_i32_81 : i32 to vector<8x8x16xi32>
    %144 = arith.cmpi slt, %142, %143 : vector<8x8x16xi32>
    %145 = vector.shape_cast %139 : vector<8x8x1xf32> to vector<8x8x1xf32>
    %146 = vector.broadcast %145 : vector<8x8x1xf32> to vector<8x8x16xf32>
    %147 = vector.shape_cast %141 : vector<1x8x1xf32> to vector<1x8x1xf32>
    %148 = vector.broadcast %147 : vector<1x8x1xf32> to vector<8x8x16xf32>
    %149 = arith.select %144, %146, %148 : vector<8x8x16xi1>, vector<8x8x16xf32>
    %150 = vector.shape_cast %149 : vector<8x8x16xf32> to vector<8x128xf32>
    %151 = arith.subf %134, %136 : vector<8x128xf32>
    %152 = arith.subf %151, %150 : vector<8x128xf32>
    %153 = math.exp %152 : vector<8x128xf32>
    %cst_82 = arith.constant 9.99999997E-7 : f32
    %154 = vector.broadcast %cst_82 : f32 to vector<8x128xf32>
    %155 = arith.addf %153, %154 : vector<8x128xf32>
    %cst_83 = arith.constant 2.500000e-01 : f32
    %156 = vector.broadcast %cst_83 : f32 to vector<8x128xf32>
    %157 = arith.mulf %156, %155 : vector<8x128xf32>
    %158 = vector.extract_strided_slice %157 {offsets = [0, 0], sizes = [8, 64], strides = [1, 1]} : vector<8x128xf32> to vector<8x64xf32>
    %159 = vector.extract_strided_slice %157 {offsets = [0, 64], sizes = [8, 64], strides = [1, 1]} : vector<8x128xf32> to vector<8x64xf32>
    %c1_84 = arith.constant 1 : index
    %c0_85 = arith.constant 0 : index
    %c0_86 = arith.constant 0 : index
    %160 = vector.load %arg7[%c1_84, %c0_85, %c0_86] : memref<2x32x128xf32, #tpu.memory_space<vmem>>, vector<1x32x128xf32>
    %161 = vector.shape_cast %160 : vector<1x32x128xf32> to vector<32x128xf32>
    %cst_87 = arith.constant dense<0.000000e+00> : vector<8x128xf32>
    %162 = tpu.matmul %122, %161, %cst_87 {dimension_numbers = #tpu.dot_dimension_numbers<[1], [0], [0], [1], [0, 0, 1, 1], [], []>} : vector<8x32xf32>, vector<32x128xf32>, vector<8x128xf32> -> vector<8x128xf32>
    %c1_88 = arith.constant 1 : index
    %c0_89 = arith.constant 0 : index
    %c0_90 = arith.constant 0 : index
    %163 = vector.load %arg8[%c1_88, %c0_89, %c0_90] : memref<2x1x128xf32, #tpu.memory_space<vmem>>, vector<1x1x128xf32>
    %164 = vector.shape_cast %163 : vector<1x1x128xf32> to vector<1x128xf32>
    %165 = vector.broadcast %164 : vector<1x128xf32> to vector<8x128xf32>
    %166 = arith.addf %162, %165 : vector<8x128xf32>
    %cst_91 = arith.constant dense<0.000000e+00> : vector<64x128xf32>
    %167 = tpu.matmul %159, %166, %cst_91 {dimension_numbers = #tpu.dot_dimension_numbers<[0], [0], [1], [1], [0, 1, 1, 1], [], []>} : vector<8x64xf32>, vector<8x128xf32>, vector<64x128xf32> -> vector<64x128xf32>
    %168 = arith.mulf %167, %3 : vector<64x128xf32>
    %cst_92 = arith.constant dense<0.000000e+00> : vector<8x128xf32>
    %169 = tpu.matmul %158, %168, %cst_92 {dimension_numbers = #tpu.dot_dimension_numbers<[1], [0], [0], [1], [0, 0, 1, 1], [], []>} : vector<8x64xf32>, vector<64x128xf32>, vector<8x128xf32> -> vector<8x128xf32>
    %cst_93 = arith.constant dense<0.000000e+00> : vector<64xf32>
    %170 = vector.multi_reduction <add>, %159, %cst_93 [0] : vector<8x64xf32> to vector<64xf32>
    %171 = vector.shape_cast %170 : vector<64xf32> to vector<1x64xf32>
    %172 = vector.broadcast %171 : vector<1x64xf32> to vector<8x64xf32>
    %173 = arith.mulf %158, %172 : vector<8x64xf32>
    %cst_94 = arith.constant dense<0.000000e+00> : vector<8x128xf32>
    %174 = tpu.matmul %173, %3, %cst_94 {dimension_numbers = #tpu.dot_dimension_numbers<[1], [0], [0], [1], [0, 0, 1, 1], [], []>} : vector<8x64xf32>, vector<64x128xf32>, vector<8x128xf32> -> vector<8x128xf32>
    %175 = tpu.reciprocal %174 : vector<8x128xf32> -> vector<8x128xf32>
    %176 = arith.mulf %169, %175 : vector<8x128xf32>
    %c1_95 = arith.constant 1 : index
    %c0_96 = arith.constant 0 : index
    %c0_97 = arith.constant 0 : index
    %177 = vector.load %arg10[%c1_95, %c0_96, %c0_97] : memref<2x128x32xf32, #tpu.memory_space<vmem>>, vector<1x128x32xf32>
    %178 = vector.shape_cast %177 : vector<1x128x32xf32> to vector<128x32xf32>
    %cst_98 = arith.constant dense<0.000000e+00> : vector<8x32xf32>
    %179 = tpu.matmul %176, %178, %cst_98 {dimension_numbers = #tpu.dot_dimension_numbers<[1], [0], [0], [1], [0, 0, 1, 1], [], []>} : vector<8x128xf32>, vector<128x32xf32>, vector<8x32xf32> -> vector<8x32xf32>
    %c1_99 = arith.constant 1 : index
    %c0_100 = arith.constant 0 : index
    %c0_101 = arith.constant 0 : index
    %180 = vector.load %arg11[%c1_99, %c0_100, %c0_101] : memref<2x1x32xf32, #tpu.memory_space<vmem>>, vector<1x1x32xf32>
    %181 = vector.shape_cast %180 : vector<1x1x32xf32> to vector<1x32xf32>
    %182 = vector.broadcast %181 : vector<1x32xf32> to vector<8x32xf32>
    %183 = arith.addf %179, %182 : vector<8x32xf32>
    %184 = arith.addf %183, %1 : vector<8x32xf32>
    %185 = arith.addf %184, %122 : vector<8x32xf32>
    %c2 = arith.constant 2 : index
    %c0_102 = arith.constant 0 : index
    %c0_103 = arith.constant 0 : index
    %186 = vector.load %arg12[%c2, %c0_102, %c0_103] : memref<3x1x32xf32, #tpu.memory_space<vmem>>, vector<1x1x32xf32>
    %187 = vector.shape_cast %186 : vector<1x1x32xf32> to vector<1x32xf32>
    %c2_104 = arith.constant 2 : index
    %c0_105 = arith.constant 0 : index
    %c0_106 = arith.constant 0 : index
    %188 = vector.load %arg13[%c2_104, %c0_105, %c0_106] : memref<3x1x32xf32, #tpu.memory_space<vmem>>, vector<1x1x32xf32>
    %189 = vector.shape_cast %188 : vector<1x1x32xf32> to vector<1x32xf32>
    %cst_107 = arith.constant dense<0.000000e+00> : vector<8xf32>
    %190 = vector.multi_reduction <add>, %185, %cst_107 [1] : vector<8x32xf32> to vector<8xf32>
    %191 = vector.shape_cast %190 : vector<8xf32> to vector<8x1xf32>
    %cst_108 = arith.constant 3.200000e+01 : f32
    %192 = vector.broadcast %cst_108 : f32 to vector<8x1xf32>
    %193 = arith.divf %191, %192 : vector<8x1xf32>
    %194 = vector.broadcast %193 : vector<8x1xf32> to vector<8x32xf32>
    %195 = arith.subf %185, %194 : vector<8x32xf32>
    %196 = arith.mulf %195, %195 : vector<8x32xf32>
    %cst_109 = arith.constant dense<0.000000e+00> : vector<8xf32>
    %197 = vector.multi_reduction <add>, %196, %cst_109 [1] : vector<8x32xf32> to vector<8xf32>
    %198 = vector.shape_cast %197 : vector<8xf32> to vector<8x1xf32>
    %cst_110 = arith.constant 3.200000e+01 : f32
    %199 = vector.broadcast %cst_110 : f32 to vector<8x1xf32>
    %200 = arith.divf %198, %199 : vector<8x1xf32>
    %201 = vector.broadcast %193 : vector<8x1xf32> to vector<8x32xf32>
    %202 = arith.subf %185, %201 : vector<8x32xf32>
    %cst_111 = arith.constant 9.99999974E-6 : f32
    %203 = vector.broadcast %cst_111 : f32 to vector<8x1xf32>
    %204 = arith.addf %200, %203 : vector<8x1xf32>
    %205 = math.rsqrt %204 : vector<8x1xf32>
    %206 = vector.broadcast %205 : vector<8x1xf32> to vector<8x32xf32>
    %207 = arith.mulf %202, %206 : vector<8x32xf32>
    %208 = vector.broadcast %187 : vector<1x32xf32> to vector<8x32xf32>
    %209 = arith.mulf %207, %208 : vector<8x32xf32>
    %210 = vector.broadcast %189 : vector<1x32xf32> to vector<8x32xf32>
    %211 = arith.addf %209, %210 : vector<8x32xf32>
    %c0_112 = arith.constant 0 : index
    %c0_113 = arith.constant 0 : index
    %212 = vector.load %arg15[%c0_112, %c0_113] : memref<32x4xf32, #tpu.memory_space<vmem>>, vector<32x4xf32>
    %cst_114 = arith.constant dense<0.000000e+00> : vector<8x4xf32>
    %213 = tpu.matmul %211, %212, %cst_114 {dimension_numbers = #tpu.dot_dimension_numbers<[1], [0], [0], [1], [0, 0, 1, 1], [], []>} : vector<8x32xf32>, vector<32x4xf32>, vector<8x4xf32> -> vector<8x4xf32>
    %c0_115 = arith.constant 0 : index
    %c0_116 = arith.constant 0 : index
    %214 = vector.load %arg16[%c0_115, %c0_116] : memref<1x4xf32, #tpu.memory_space<vmem>>, vector<1x4xf32>
    %215 = vector.broadcast %214 : vector<1x4xf32> to vector<8x4xf32>
    %216 = arith.addf %213, %215 : vector<8x4xf32>
    %cst_117 = arith.constant 0.000000e+00 : f32
    %217 = vector.broadcast %cst_117 : f32 to vector<8x4xf32>
    %218 = arith.maximumf %216, %217 : vector<8x4xf32>
    %219 = vector.shape_cast %218 : vector<8x4xf32> to vector<1x8x4xf32>
    %cst_118 = arith.constant dense<0.000000e+00> : vector<1xf32>
    %220 = vector.multi_reduction <add>, %219, %cst_118 [1, 2] : vector<1x8x4xf32> to vector<1xf32>
    %221 = vector.shape_cast %220 : vector<1xf32> to vector<1x1x1xf32>
    %222 = vector.extract %221[0, 0, 0] : f32 from vector<1x1x1xf32>
    %cst_119 = arith.constant 0.000000e+00 : f32
    %223 = vector.broadcast %cst_119 : f32 to vector<1x1x128xf32>
    %224 = vector.broadcast %222 : f32 to vector<1x1x128xf32>
    %225 = arith.addf %223, %224 : vector<1x1x128xf32>
    %c0_120 = arith.constant 0 : index
    %c0_121 = arith.constant 0 : index
    %c0_122 = arith.constant 0 : index
    %226 = vector.load %arg17[%c0_120, %c0_121, %c0_122] : memref<1x1x128xf32, #tpu.memory_space<vmem>>, vector<1x1x128xf32>
    tpu.vector_store %arg17[%c0_120, %c0_121, %c0_122], %225 {strides = array<i32>} : memref<1x1x128xf32, #tpu.memory_space<vmem>>, vector<1x1x128xf32>,
    return
  }
  func.func @transform_0(%arg0: i32) -> (i32, i32, i32) {
    %c0_i32 = arith.constant 0 : i32
    %c0_i32_0 = arith.constant 0 : i32
    %c0_i32_1 = arith.constant 0 : i32
    return %arg0, %c0_i32, %c0_i32_0 : i32, i32, i32
  }
  func.func @transform_1(%arg0: i32) -> (i32, i32) {
    %c0_i32 = arith.constant 0 : i32
    %c0_i32_0 = arith.constant 0 : i32
    %c0_i32_1 = arith.constant 0 : i32
    return %c0_i32, %c0_i32_0 : i32, i32
  }
  func.func @transform_2(%arg0: i32) -> (i32, i32, i32) {
    %c0_i32 = arith.constant 0 : i32
    %c0_i32_0 = arith.constant 0 : i32
    %c0_i32_1 = arith.constant 0 : i32
    %c0_i32_2 = arith.constant 0 : i32
    return %c0_i32, %c0_i32_0, %c0_i32_1 : i32, i32, i32
  }
  func.func @transform_3(%arg0: i32) -> (i32, i32, i32) {
    %c0_i32 = arith.constant 0 : i32
    %c0_i32_0 = arith.constant 0 : i32
    %c0_i32_1 = arith.constant 0 : i32
    %c0_i32_2 = arith.constant 0 : i32
    return %c0_i32, %c0_i32_0, %c0_i32_1 : i32, i32, i32
  }
  func.func @transform_4(%arg0: i32) -> (i32, i32, i32) {
    %c0_i32 = arith.constant 0 : i32
    %c0_i32_0 = arith.constant 0 : i32
    %c0_i32_1 = arith.constant 0 : i32
    %c0_i32_2 = arith.constant 0 : i32
    return %c0_i32, %c0_i32_0, %c0_i32_1 : i32, i32, i32
  }
  func.func @transform_5(%arg0: i32) -> (i32, i32) {
    %c0_i32 = arith.constant 0 : i32
    %c0_i32_0 = arith.constant 0 : i32
    %c0_i32_1 = arith.constant 0 : i32
    return %c0_i32, %c0_i32_0 : i32, i32
  }
  func.func @transform_6(%arg0: i32) -> (i32, i32, i32) {
    %c0_i32 = arith.constant 0 : i32
    %c0_i32_0 = arith.constant 0 : i32
    %c0_i32_1 = arith.constant 0 : i32
    %c0_i32_2 = arith.constant 0 : i32
    return %c0_i32, %c0_i32_0, %c0_i32_1 : i32, i32, i32
  }
  func.func @transform_7(%arg0: i32) -> (i32, i32, i32) {
    %c0_i32 = arith.constant 0 : i32
    %c0_i32_0 = arith.constant 0 : i32
    %c0_i32_1 = arith.constant 0 : i32
    %c0_i32_2 = arith.constant 0 : i32
    return %c0_i32, %c0_i32_0, %c0_i32_1 : i32, i32, i32
  }
  func.func @transform_8(%arg0: i32) -> (i32, i32) {
    %c0_i32 = arith.constant 0 : i32
    %c0_i32_0 = arith.constant 0 : i32
    %c0_i32_1 = arith.constant 0 : i32
    return %c0_i32, %c0_i32_0 : i32, i32
  }
  func.func @transform_9(%arg0: i32) -> (i32, i32, i32) {
    %c0_i32 = arith.constant 0 : i32
    %c0_i32_0 = arith.constant 0 : i32
    %c0_i32_1 = arith.constant 0 : i32
    %c0_i32_2 = arith.constant 0 : i32
    return %c0_i32, %c0_i32_0, %c0_i32_1 : i32, i32, i32
  }
  func.func @transform_10(%arg0: i32) -> (i32, i32, i32) {
    %c0_i32 = arith.constant 0 : i32
    %c0_i32_0 = arith.constant 0 : i32
    %c0_i32_1 = arith.constant 0 : i32
    %c0_i32_2 = arith.constant 0 : i32
    return %c0_i32, %c0_i32_0, %c0_i32_1 : i32, i32, i32
  }
  func.func @transform_11(%arg0: i32) -> (i32, i32, i32) {
    %c0_i32 = arith.constant 0 : i32
    %c0_i32_0 = arith.constant 0 : i32
    %c0_i32_1 = arith.constant 0 : i32
    %c0_i32_2 = arith.constant 0 : i32
    return %c0_i32, %c0_i32_0, %c0_i32_1 : i32, i32, i32
  }
  func.func @transform_12(%arg0: i32) -> (i32, i32, i32) {
    %c0_i32 = arith.constant 0 : i32
    %c0_i32_0 = arith.constant 0 : i32
    %c0_i32_1 = arith.constant 0 : i32
    %c0_i32_2 = arith.constant 0 : i32
    return %c0_i32, %c0_i32_0, %c0_i32_1 : i32, i32, i32
  }
  func.func @transform_13(%arg0: i32) -> (i32, i32) {
    %c0_i32 = arith.constant 0 : i32
    %c0_i32_0 = arith.constant 0 : i32
    %c0_i32_1 = arith.constant 0 : i32
    return %c0_i32, %c0_i32_0 : i32, i32
  }
  func.func @transform_14(%arg0: i32) -> (i32, i32) {
    %c0_i32 = arith.constant 0 : i32
    %c0_i32_0 = arith.constant 0 : i32
    %c0_i32_1 = arith.constant 0 : i32
    return %c0_i32, %c0_i32_0 : i32, i32
  }
  func.func @transform_15(%arg0: i32) -> (i32, i32) {
    %c0_i32 = arith.constant 0 : i32
    %c0_i32_0 = arith.constant 0 : i32
    %c0_i32_1 = arith.constant 0 : i32
    return %c0_i32, %c0_i32_0 : i32, i32
  }
  func.func @transform_16(%arg0: i32) -> (i32, i32, i32) {
    %c0_i32 = arith.constant 0 : i32
    %c0_i32_0 = arith.constant 0 : i32
    %c0_i32_1 = arith.constant 0 : i32
    return %arg0, %c0_i32, %c0_i32_0 : i32, i32, i32
  }
}

</mosaic_0001>

<bundles_post_ra>
// kernel: multiinf_surrogate_forward.1
= control target key start
LH: loop header
LB: loop body
LE: loop exit
PB: predicated region body
PF: predicated region fallthrough
CT: control target
= control target key end

     0   :  { %s5319_s0 = inlined_call_operand.vmem [shape: f32[2,8,32], index: 0, kind: input, shape index: {}]   ;;  %s5320_s1 = inlined_call_operand.vmem [shape: f32[8,32], index: 1, kind: input, shape index: {}]   ;;  %s5321_s2 = inlined_call_operand.hbm [shape: f32[2,32,256], index: 2, kind: input, shape index: {}]   ;;  %s5322_s3 = inlined_call_operand.vmem [shape: f32[2,1,256], index: 3, kind: input, shape index: {}]   ;;  %s5323_s4 = inlined_call_operand.vmem [shape: f32[2,256,128], index: 4, kind: input, shape index: {}]   ;;  %s5324_s5 = inlined_call_operand.hbm [shape: f32[256,128], index: 5, kind: input, shape index: {}]   ;;  %s5325_s6 = inlined_call_operand.hbm [shape: f32[2,32,128], index: 6, kind: input, shape index: {}]   ;;  %s5326_s7 = inlined_call_operand.vmem [shape: f32[2,1,128], index: 7, kind: input, shape index: {}]   ;;  %s5327_s8 = inlined_call_operand.hbm [shape: f32[64,128], index: 8, kind: input, shape index: {}]   ;;  %s5328_s9 = inlined_call_operand.vmem [shape: f32[2,128,32], index: 9, kind: input, shape index: {}]   ;;  %s5329_s10 = inlined_call_operand.vmem [shape: f32[2,1,32], index: 10, kind: input, shape index: {}]   ;;  %s5330_s11 = inlined_call_operand.vmem [shape: f32[3,1,32], index: 11, kind: input, shape index: {}]   ;;  %s5331_s12 = inlined_call_operand.vmem [shape: f32[3,1,32], index: 12, kind: input, shape index: {}]   ;;  %s5332_s13 = inlined_call_operand.vmem [shape: f32[8,32], index: 13, kind: input, shape index: {}]   ;;  %s5333_s14 = inlined_call_operand.vmem [shape: f32[32,4], index: 14, kind: input, shape index: {}]   ;;  %s5334_s15 = inlined_call_operand.vmem [shape: f32[1,4], index: 15, kind: input, shape index: {}]   ;;  %s5335_s16 = inlined_call_operand.vmem [shape: f32[2,1,128], index: 16, kind: output, shape index: {}]  }
   0x1   :  { %5344 = sst [smem:[#allocation13_spill]] %s5319_s0 }
   0x2   :  { %5345 = sst [smem:[#allocation14_spill]] %s5324_s5 }
   0x3   :  { %5346 = sst [smem:[#allocation15_spill]] %s5333_s14 }
   0x4   :  { %5347 = sst [smem:[#allocation16_spill]] %s5334_s15 }
   0x5   :  { %5348 = sst [smem:[#allocation17_spill]] %s5335_s16 }
   0x6   :  { %21 = vsyncpa [#allocation3], 0 }
   0x7   :  { %22 = vsyncpa [#allocation5], 0 }
   0x8   :  { %23 = vsyncpa [#allocation8], 0  ;;  %s4356_s21 = smov 0  }
   0x9 LB: > { %5349 = sst [smem:[#allocation12_spill]] %s4249_s21  ;;  %s4251_s22 = smov [#allocation4]   ;;  %s4249_s21 = sphi %s4356_s21, %s29_s21  }
   0xa   : > { %s435_s23 = sshll.u32 %s4251_s22, 4  ;;  %s4362_s24 = sadd.s32 4294967295, %s4249_s21   ;;  %s4367_s23 = int_to_ptr.vmem [resolvable:$true] %s435_s23 }
   0xb   : > { %p3225_p0 = scmp.ge.s32.totalorder %s4249_s21, 1  ;;  %p401_p1 = scmp.lt.s32.totalorder %s4249_s21, 3 }
   0xc   : > { %p5342_p2 = scmp.eq.s32.totalorder %s4362_s24, 0  ;;  %s4252_s26 = smov [#allocation2]  }
   0xd   : > { %p4369_p3 = pnand %p3225_p0, %p401_p1  ;;  %s416_s27 = sshll.u32 %s4252_s26, 4  ;;  %s4375_s27 = int_to_ptr.vmem [resolvable:$true] %s416_s27 }
   0xe   : > { %s4253_s29 = smov [#allocation6]   ;;  %s5352_s5 = sld [smem:[#allocation14_spill]] }
   0xf   : > { %s5350_s25 = scalar_select %p4369_p3, 1, 0 }
  0x10   : > { %p4056_p4 = pneg %p4369_p3  ;;  %s4383_s30 = sshll.u32 %s4253_s29, 4  ;;  %s449_s30 = int_to_ptr.vmem [resolvable:$true] %s4383_s30 }
  0x12   : > { %p4379_p5 = pnand %p5342_p2, %p4056_p4 }
  0x14   : > { %s4119_s18 = scalar_lea.hbm %s5352_s5, 4096  ;;  %p4393_p7 = pneg %p4379_p5 }
  0x15   : > { %p4120_p6 = scmp.ne.s32.totalorder %s5352_s5, %s4119_s18  ;;  %p4126_p10 = scmp.lt.u32.totalorder %s4119_s18, %s5352_s5 }
  0x17   : > { %p4122_p8 = pnand %p4393_p7, %p4120_p6 }
  0x19   : > { %p4123_p9 = pneg %p4122_p8 }
  0x1b   : > { %p4128_p11 = pnand %p4126_p10, %p4123_p9 }
  0x1d   : > { %4131 = shalt.err (!%p4128_p11)
}
  0x1e   : > { %s4132_s0 = scalar_lea.vmem %s4367_s23, 4096  ;;  %p4140_p1 = scmp.lt.s32.totalorder %s4367_s23, %s4367_s23 }
  0x1f   : > { %p4133_p12 = scmp.ne.s32.totalorder %s4367_s23, %s4132_s0  ;;  %p4141_p4 = scmp.lt.s32.totalorder %s4132_s0, %s4132_s0 }
  0x21   : > { %p4135_p13 = pnand %p4133_p12, %p4393_p7  ;;  %p4142_p6 = por %p4141_p4, %p4140_p1 }
  0x23   : > { %p4136_p0 = pneg %p4135_p13 }
  0x25   : > { %p4143_p8 = pnand %p4142_p6, %p4136_p0 }
  0x27   : > { %4146 = shalt.err (!%p4143_p8)
}
  0x28   : > { %s5338_s17 = smov 128   ;;  %s5340_s18 = smov 8  }
  0x29   : > { %4062 = dma.hbm_to_vmem [thread:$0]  (!%p4379_p5), %s5352_s5, 4096, %s4367_s23, [#allocation5], %s5338_s17, %s5338_s17, %s5340_s18  }
  0x2a   : > { %s4147_s0 = scalar_lea.hbm %s5321_s2, 2048 }
  0x2b   : > { %p4148_p9 = scmp.ne.s32.totalorder %s5321_s2, %s4147_s0  ;;  %p4154_p12 = scmp.lt.u32.totalorder %s4147_s0, %s5321_s2 }
  0x2d   : > { %p4150_p10 = pnand %p4148_p9, %p4393_p7 }
  0x2f   : > { %p4151_p11 = pneg %p4150_p10 }
  0x31   : > { %p4156_p13 = pnand %p4154_p12, %p4151_p11 }
  0x33   : > { %4159 = shalt.err (!%p4156_p13)
}
  0x34   : > { %s4160_s23 = scalar_lea.vmem %s4375_s27, 2048  ;;  %p4168_p6 = scmp.lt.s32.totalorder %s4375_s27, %s4375_s27 }
  0x35   : > { %p4161_p0 = scmp.ne.s32.totalorder %s4375_s27, %s4160_s23  ;;  %p4169_p8 = scmp.lt.s32.totalorder %s4160_s23, %s4160_s23 }
  0x37   : > { %p4163_p1 = pnand %p4161_p0, %p4393_p7  ;;  %p4170_p9 = por %p4169_p8, %p4168_p6 }
  0x39   : > { %p4164_p4 = pneg %p4163_p1 }
  0x3b   : > { %p4171_p10 = pnand %p4170_p9, %p4164_p4 }
  0x3d   : > { %4174 = shalt.err (!%p4171_p10)
}
  0x3e   : > { %s4256_s16 = smov 256   ;;  %s4257_s14 = smov 16  }
  0x3f   : > { %4059 = dma.hbm_to_vmem [thread:$0]  (!%p4379_p5), %s5321_s2, 2048, %s4375_s27, [#allocation3], %s4256_s16, %s4256_s16, %s4257_s14  }
  0x40   : > { %s4258_s19 = smov [#allocation7]   ;;  %s4175_s0 = scalar_lea.hbm %s5325_s6, 1024 }
  0x41   : > { %s464_s20 = sshll.u32 %s4258_s19, 4  ;;  %p4176_p11 = scmp.ne.s32.totalorder %s5325_s6, %s4175_s0  ;;  %s465_s20 = int_to_ptr.vmem [resolvable:$true] %s464_s20 }
  0x42   : > { %p4182_p0 = scmp.lt.u32.totalorder %s4175_s0, %s5325_s6 }
  0x43   : > { %p4178_p12 = pnand %p4176_p11, %p4393_p7 }
  0x45   : > { %p4179_p13 = pneg %p4178_p12 }
  0x47   : > { %p4184_p1 = pnand %p4182_p0, %p4179_p13 }
  0x49   : > { %4187 = shalt.err (!%p4184_p1)
}
  0x4a   : > { %s4188_s27 = scalar_lea.vmem %s449_s30, 1024  ;;  %p4196_p9 = scmp.lt.s32.totalorder %s449_s30, %s449_s30 }
  0x4b   : > { %p4189_p4 = scmp.ne.s32.totalorder %s449_s30, %s4188_s27  ;;  %p4197_p10 = scmp.lt.s32.totalorder %s4188_s27, %s4188_s27 }
  0x4d   : > { %p4191_p6 = pnand %p4189_p4, %p4393_p7  ;;  %p4198_p2 = por %p4197_p10, %p4196_p9 }
  0x4f   : > { %p4192_p8 = pneg %p4191_p6 }
  0x51   : > { %p4199_p3 = pnand %p4198_p2, %p4192_p8 }
  0x53   : > { %4202 = shalt.err (!%p4199_p3)
}
  0x54   : > { %s5354_s17 = smov 8   ;;  %s5355_s16 = smov 128  }
  0x55   : > { %4065 = dma.hbm_to_vmem [thread:$0]  (!%p4379_p5), %s5325_s6, 1024, %s449_s30, [#allocation5], %s5355_s16, %s5355_s16, %s5354_s17  }
  0x56   : > { %s4203_s21 = scalar_lea.hbm %s5327_s8, 1024 }
  0x57   : > { %p4204_p2 = scmp.ne.s32.totalorder %s5327_s8, %s4203_s21  ;;  %p4210_p12 = scmp.lt.u32.totalorder %s4203_s21, %s5327_s8 }
  0x59   : > { %p4206_p3 = pnand %p4204_p2, %p4393_p7 }
  0x5b   : > { %p4207_p11 = pneg %p4206_p3 }
  0x5d   : > { %p4212_p13 = pnand %p4210_p12, %p4207_p11 }
  0x5f   : > { %4215 = shalt.err (!%p4212_p13)
}
  0x60   : > { %s4216_s23 = scalar_lea.vmem %s465_s20, 1024  ;;  %p4224_p6 = scmp.lt.s32.totalorder %s465_s20, %s465_s20 }
  0x61   : > { %p4217_p0 = scmp.ne.s32.totalorder %s465_s20, %s4216_s23  ;;  %p4225_p8 = scmp.lt.s32.totalorder %s4216_s23, %s4216_s23 }
  0x63   : > { %p4219_p1 = pnand %p4217_p0, %p4393_p7  ;;  %p4226_p9 = por %p4225_p8, %p4224_p6 }
  0x65   : > { %p4220_p4 = pneg %p4219_p1 }
  0x67   : > { %p4227_p10 = pnand %p4226_p9, %p4220_p4 }
  0x69   : > { %4230 = shalt.err (!%p4227_p10)
}
  0x6a   : > { %4068 = dma.hbm_to_vmem [thread:$0]  (!%p4379_p5), %s5327_s8, 1024, %s465_s20, [#allocation8], %s5355_s16, %s5355_s16, %s5354_s17  }
  0x6b   : > { %p5356_p2 = scmp.ne.s32.totalorder %s5350_s25, 0 }
  0x6c   : > { %p5357_p7 = scmp.eq.s32.totalorder (!%p5356_p2), %s4362_s24, 0 }
  0x6d   : > { %508 = sbr.rel (%p5356_p2) target bundleno = 4124 (0x101c), region = 84 }
  0x74   : > { %4236 = dma.done.wait (%p5357_p7), [#allocation3], 2048   ;;  %p5358_p3 = pmov %p5357_p7 }
  0x76   : > { %4238 = vsyncadd (%p5358_p3), [#allocation3], 4294965248  ;;  %p5359_p11 = pmov %p5358_p3 }
  0x77   : > { %p5360_p12 = pmov %p5358_p3 }
  0x78   : > { %4240 = dma.done.wait (%p5359_p11), [#allocation5], 5120  }
  0x79   : > { %4242 = vsyncadd (%p5360_p12), [#allocation5], 4294962176  ;;  %p5361_p13 = pmov %p5358_p3 }
  0x7a   : > { %p5362_p5 = pmov %p5358_p3 }
  0x7b   : > { %4244 = dma.done.wait (%p5361_p13), [#allocation8], 1024  }
  0x7c   : > { %4246 = vsyncadd (%p5362_p5), [#allocation8], 4294966272  ;;  %v4259_v0 = vmov 0.0   ;;  %v650_v1 = vld [vmem:[#allocation2 + $0x8] sm:$0xff]  ;;  %v652_v2 = vld [vmem:[#allocation2 + $0x18] sm:$0xff]  ;;  %vm619_vm0 = vcmask 261120  }
  0x7d   : > { %736 = vmatprep.mubr.f32.mxu1 %v4259_v0  ;;  %v649_v3 = vld [vmem:[#allocation2] sm:$0xff]  ;;  %v3780_v4 = vpack.c.bf16 %v652_v2, %v650_v1  ;;  %v651_v5 = vld [vmem:[#allocation2 + $0x10] sm:$0xff]  ;;  %v654_v6 = vld [vmem:[#allocation2 + $0x28] sm:$0xff]  ;;  %p567_p0 = scmp.lt.s32.totalorder %s4362_s24, 1  ;;  %s5363_s23 = sld [smem:[#allocation13_spill]]  ;;  %vm4268_vm1 = vmmov 0  }
  0x7e   : > { %v656_v7 = vld [vmem:[#allocation2 + $0x38] sm:$0xff]  ;;  %v3782_v8 = vpack.c.bf16 %v651_v5, %v649_v3  ;;  %v653_v10 = vld [vmem:[#allocation2 + $0x20] sm:$0xff]  ;;  %v655_v11 = vld [vmem:[#allocation2 + $0x30] sm:$0xff]  ;;  %s4260_s28 = smov 96   ;;  %s4261_s22 = smov 112   ;;  %vm1077_vm2 = vcmask 130048  }
  0x7f   : > { %v3784_v9 = vpack.c.bf16 %v656_v7, %v654_v6  ;;  %3781 = vmatprep.subr.bf16.mxu1 %v3780_v4  ;;  %v761_v12 = vld [vmem:[%s5323_s4 + $0x80] sm:$0xff]  ;;  %v762_v13 = vld [vmem:[%s5323_s4 + $0x88] sm:$0xff]  ;;  %v3786_v14 = vpack.c.bf16 %v655_v11, %v653_v10  ;;  %v763_v25 = vld [vmem:[%s5323_s4 + $0x90] sm:$0xff]  ;;  %s5369_s24 = smov (!%p567_p0, %s4362_s24), 1  ;;  %s4262_s20 = smov 80   ;;  %vm1286_vm4 = vcmask 392192  }
  0x80   : > { %3783 = vmatpush1.bf16.msra.mxu1 %v3782_v8  ;;  %v745_v15 = vld [vmem:[%s5323_s4] sm:$0xff]  ;;  %v593_v17 = vld [vmem:[#allocation4 + $0x88] sm:$0xff]  ;;  %v3788_v18 = vpack.c.bf16 %v762_v13, %v761_v12  ;;  %v764_v26 = vld [vmem:[%s5323_s4 + $0x98] sm:$0xff]  ;;  %s3236_s26 = sshll.u32 %s5369_s24, 3  ;;  %s4263_s17 = smov 64   ;;  %vm1288_vm5 = vcmask 523264  }
  0x81   : > { %v592_v16 = vld [vmem:[#allocation4 + $0x80] sm:$0xff]  ;;  %3785 = vmatprep.subr.bf16.mxu1 %v3784_v9  ;;  %v746_v19 = vld [vmem:[%s5323_s4 + $0x8] sm:$0xff]  ;;  %v594_v27 = vld [vmem:[#allocation4 + $0x90] sm:$0xff]  ;;  %v3792_v35 = vpack.c.bf16 %v764_v26, %v763_v25  ;;  %s4264_s16 = smov 48   ;;  %s4265_s5 = smov 32   ;;  %vm1290_vm6 = vcmask 654336  }
  0x82   : > { %v4510_v20 = vpack.c.bf16 %v593_v17, %v592_v16  ;;  %v576_v21 = vld [vmem:[#allocation4] sm:$0xff]  ;;  %v577_v22 = vld [vmem:[#allocation4 + $0x8] sm:$0xff]  ;;  %v595_v28 = vld [vmem:[#allocation4 + $0x98] sm:$0xff]  ;;  %v3790_v30 = vpack.c.bf16 %v746_v19, %v745_v15  ;;  %s4266_s18 = smov 16   ;;  %vm1292_vm7 = vcmask 785408   ;;  %vm1294_vm8 = vcmask 916480  }
  0x83   : > { %v4515_v23 = vld [vmem:[%s5320_s1] sm:$0xff]  ;;  %v4517_v24 = vpack.c.bf16 %v577_v22, %v576_v21  ;;  %v578_v29 = vld [vmem:[#allocation4 + $0x10] sm:$0xff]  ;;  %v748_v32 = vld [vmem:[%s5323_s4 + $0x18] sm:$0xff]  ;;  %v4533_v33 = vpack.c.bf16 %v595_v28, %v594_v27  ;;  %s570_s30 = scalar_lea.vmem %s5363_s23, %s3236_s26  ;;  %vm1632_vm9 = vcmask 1048064   ;;  %vm1422_vm10 = vcmask 64512   ;;  %s5365_s25 = sld [smem:[#allocation16_spill]] }
  0x84   : > { %3821 = vmatprep.subr.bf16.mxu0 %v4510_v20  ;;  %3787 = vmatpush1.bf16.msra.mxu1 %v3786_v14  ;;  %v747_v31 = vld [vmem:[%s5323_s4 + $0x10] sm:$0xff]  ;;  %v579_v34 = vld [vmem:[#allocation4 + $0x18] sm:$0xff]  ;;  %v765_v37 = vld [vmem:[%s5323_s4 + $0xa0] sm:$0xff]  ;;  %vm3121_vm11 = vcmask 31744  }
  0x85   : > { %3823 = vmatpush3.bf16.msra.mxu0 %v4517_v24  ;;  %3789 = vmatprep.subr.bf16.mxu1 %v3788_v18  ;;  %v4535_v36 = vpack.c.bf16 %v579_v34, %v578_v29  ;;  %v766_v38 = vld [vmem:[%s5323_s4 + $0xa8] sm:$0xff]  ;;  %v596_v39 = vld [vmem:[#allocation4 + $0xa0] sm:$0xff]  ;;  %v3794_v44 = vpack.c.bf16 %v748_v32, %v747_v31  ;;  %v598_v47 = vld [vmem:[#allocation4 + $0xb0] sm:$0xff] }
  0x86   : > { %3825 = vmatprep.subr.bf16.mxu0 %v4533_v33  ;;  %v597_v40 = vld [vmem:[#allocation4 + $0xa8] sm:$0xff]  ;;  %v580_v41 = vld [vmem:[#allocation4 + $0x20] sm:$0xff]  ;;  %v599_v48 = vld [vmem:[#allocation4 + $0xb8] sm:$0xff]  ;;  %v3796_v49 = vpack.c.bf16 %v766_v38, %v765_v37 }
  0x87   : > { %v581_v42 = vld [vmem:[#allocation4 + $0x28] sm:$0xff]  ;;  %3239 = vmatmul.mubr.msk.f32.vlgmr.msra.gmra.mrb[0].mxu1 %vm619_vm0, %v4515_v23  ;;  %v4546_v43 = vpack.c.bf16 %v597_v40, %v596_v39  ;;  %v749_v45 = vld [vmem:[%s5323_s4 + $0x20] sm:$0xff]  ;;  %v4558_v51 = vpack.c.bf16 %v599_v48, %v598_v47  ;;  %v582_v52 = vld [vmem:[#allocation4 + $0x30] sm:$0xff] }
  0x88   : > { %3791 = vmatpush3.bf16.msra.mxu1 %v3790_v30  ;;  %v4552_v46 = vpack.c.bf16 %v581_v42, %v580_v41  ;;  %v750_v50 = vld [vmem:[%s5323_s4 + $0x28] sm:$0xff]  ;;  %v583_v53 = vld [vmem:[#allocation4 + $0x38] sm:$0xff]  ;;  %v767_v54 = vld [vmem:[%s5323_s4 + $0xb0] sm:$0xff] }
  0x89   : > { %3827 = vmatpush3.bf16.msra.mxu0 %v4535_v36  ;;  %3793 = vmatprep.subr.bf16.mxu1 %v3792_v35  ;;  %v768_v55 = vld [vmem:[%s5323_s4 + $0xb8] sm:$0xff]  ;;  %v600_v56 = vld [vmem:[#allocation4 + $0xc0] sm:$0xff]  ;;  %v601_v57 = vld [vmem:[#allocation4 + $0xc8] sm:$0xff]  ;;  %v3798_v58 = vpack.c.bf16 %v750_v50, %v749_v45  ;;  %v4573_v61 = vpack.c.bf16 %v583_v53, %v582_v52 }
  0x8a   : > { %3829 = vmatprep.subr.bf16.mxu0 %v4546_v43  ;;  %v751_v59 = vld [vmem:[%s5323_s4 + $0x30] sm:$0xff]  ;;  %v752_v60 = vld [vmem:[%s5323_s4 + $0x38] sm:$0xff]  ;;  %v3800_v62 = vpack.c.bf16 %v768_v55, %v767_v54  ;;  %v769_v63 = vld [vmem:[%s5323_s4 + $0xc0] sm:$0xff]  ;;  %v4579_v1 = vpack.c.bf16 %v601_v57, %v600_v56  ;;  %v659_v57 = vlaneseq }
  0x8b   : > { %v584_v2 = vld [vmem:[#allocation4 + $0x40] sm:$0xff]  ;;  %v585_v3 = vld [vmem:[#allocation4 + $0x48] sm:$0xff]  ;;  %v602_v5 = vld [vmem:[#allocation4 + $0xd0] sm:$0xff]  ;;  %v3802_v7 = vpack.c.bf16 %v752_v60, %v751_v59 }
  0x8c   : > { %3795 = vmatpush3.bf16.msra.mxu1 %v3794_v44  ;;  %v770_v4 = vld [vmem:[%s5323_s4 + $0xc8] sm:$0xff]  ;;  %v603_v6 = vld [vmem:[#allocation4 + $0xd8] sm:$0xff]  ;;  %v753_v8 = vld [vmem:[%s5323_s4 + $0x40] sm:$0xff]  ;;  %v4588_v9 = vpack.c.bf16 %v585_v3, %v584_v2 }
  0x8d   : > { %3831 = vmatpush3.bf16.msra.mxu0 %v4552_v46  ;;  %3797 = vmatprep.subr.bf16.mxu1 %v3796_v49  ;;  %v3804_v10 = vpack.c.bf16 %v770_v4, %v769_v63  ;;  %v754_v11 = vld [vmem:[%s5323_s4 + $0x48] sm:$0xff]  ;;  %v4594_v12 = vpack.c.bf16 %v603_v6, %v602_v5  ;;  %v586_v13 = vld [vmem:[#allocation4 + $0x50] sm:$0xff]  ;;  %v587_v14 = vld [vmem:[#allocation4 + $0x58] sm:$0xff] }
  0x8e   : > { %3833 = vmatprep.subr.bf16.mxu0 %v4558_v51  ;;  %v771_v15 = vld [vmem:[%s5323_s4 + $0xd0] sm:$0xff]  ;;  %v772_v16 = vld [vmem:[%s5323_s4 + $0xd8] sm:$0xff]  ;;  %v3806_v17 = vpack.c.bf16 %v754_v11, %v753_v8  ;;  %v4603_v18 = vpack.c.bf16 %v587_v14, %v586_v13  ;;  %v773_v25 = vld [vmem:[%s5323_s4 + $0xe0] sm:$0xff] }
  0x8f   : > { %v3808_v19 = vpack.c.bf16 %v772_v16, %v771_v15  ;;  %v755_v21 = vld [vmem:[%s5323_s4 + $0x50] sm:$0xff]  ;;  %v756_v22 = vld [vmem:[%s5323_s4 + $0x58] sm:$0xff]  ;;  %v774_v26 = vld [vmem:[%s5323_s4 + $0xe8] sm:$0xff] }
  0x90   : > { %3799 = vmatpush3.bf16.msra.mxu1 %v3798_v58  ;;  %v3810_v27 = vpack.c.bf16 %v756_v22, %v755_v21  ;;  %v3812_v28 = vpack.c.bf16 %v774_v26, %v773_v25  ;;  %v757_v29 = vld [vmem:[%s5323_s4 + $0x60] sm:$0xff]  ;;  %v758_v30 = vld [vmem:[%s5323_s4 + $0x68] sm:$0xff]  ;;  %v775_v40 = vld [vmem:[%s5323_s4 + $0xf0] sm:$0xff]  ;;  %v4658_v58 = vshrl.u32 %v659_v57, 7 }
  0x91   : > { %3835 = vmatpush3.bf16.msra.mxu0 %v4573_v61  ;;  %3801 = vmatprep.subr.bf16.mxu1 %v3800_v62  ;;  %v3814_v31 = vpack.c.bf16 %v758_v30, %v757_v29  ;;  %v604_v32 = vld [vmem:[#allocation4 + $0xe0] sm:$0xff]  ;;  %v605_v34 = vld [vmem:[#allocation4 + $0xe8] sm:$0xff]  ;;  %v776_v41 = vld [vmem:[%s5323_s4 + $0xf8] sm:$0xff] }
  0x92   : > { %3837 = vmatprep.subr.bf16.mxu0 %v4579_v1  ;;  %v4625_v35 = vpack.c.bf16 %v605_v34, %v604_v32  ;;  %v588_v37 = vld [vmem:[#allocation4 + $0x60] sm:$0xff]  ;;  %v589_v38 = vld [vmem:[#allocation4 + $0x68] sm:$0xff]  ;;  %v3816_v42 = vpack.c.bf16 %v776_v41, %v775_v40  ;;  %v759_v44 = vld [vmem:[%s5323_s4 + $0x70] sm:$0xff]  ;;  %v661_v59 = vsub.s32 0, %v4658_v58  ;;  %v665_v62 = vsub.s32 1, %v4658_v58 }
  0x93   : > { %v4627_v39 = vpack.c.bf16 %v589_v38, %v588_v37  ;;  %v760_v45 = vld [vmem:[%s5323_s4 + $0x78] sm:$0xff]  ;;  %v606_v48 = vld [vmem:[#allocation4 + $0xf0] sm:$0xff]  ;;  %v616_v55 = vld [vmem:[%s570_s30] sm:$0xff]  ;;  %v4267_v34 = vmov 0.0|0.0   ;;  %v4269_v41 = vmov 1983009808  }
  0x94   : > { %3803 = vmatpush3.bf16.msra.mxu1 %v3802_v7  ;;  %v3818_v47 = vpack.c.bf16 %v760_v45, %v759_v44  ;;  %v607_v49 = vld [vmem:[#allocation4 + $0xf8] sm:$0xff]  ;;  %v590_v52 = vld [vmem:[#allocation4 + $0x70] sm:$0xff]  ;;  %v620_v56 = vsel %vm619_vm0, %v616_v55, 0.0  ;;  %v657_v60 = vld [vmem:[%s5322_s3] sm:$0x3]  ;;  %vm1111_vm3 = vcmp.lt.s32.totalorder %v4658_v58, 4 }
  0x95   : > { %3839 = vmatpush3.bf16.msra.mxu0 %v4588_v9  ;;  %3805 = vmatprep.subr.bf16.mxu1 %v3804_v10  ;;  %v4643_v50 = vpack.c.bf16 %v607_v49, %v606_v48  ;;  %v591_v53 = vld [vmem:[#allocation4 + $0x78] sm:$0xff]  ;;  %v662_v63 = vrot.slane %v657_v60, %v661_v59  ;;  %v666_v2 = vrot.slane %v657_v60, %v665_v62  ;;  %v1303_v29 = vld [vmem:[#allocation6 + $0x8] sm:$0xff]  ;;  %v4270_v49 = vmov 1934713408  }
  0x96   : > { %3841 = vmatprep.subr.bf16.mxu0 %v4594_v12  ;;  %v4645_v54 = vpack.c.bf16 %v591_v53, %v590_v52  ;;  %621 = vadd.xlane.f32.xlu0 %v620_v56  ;;  %v1305_v32 = vld [vmem:[#allocation6 + $0x18] sm:$0xff]  ;;  %v1008_v52 = vunpack.c.l.s4 %v4270_v49 }
  0x98   : > { %3807 = vmatpush3.bf16.msra.mxu1 %v3806_v17 }
  0x99   : > { %3843 = vmatpush3.bf16.msra.mxu0 %v4603_v18  ;;  %3809 = vmatprep.subr.bf16.mxu1 %v3808_v19 }
  0x9a   : > { %3845 = vmatprep.subr.bf16.mxu0 %v4625_v35 }
  0x9c   : > { %3811 = vmatpush3.bf16.msra.mxu1 %v3810_v27 }
  0x9d   : > { %3813 = vmatprep.subr.bf16.mxu1 %v3812_v28  ;;  %3847 = vmatpush3.bf16.msra.mxu0 %v4627_v39  ;;  %v1302_v28 = vld [vmem:[#allocation6] sm:$0xff] }
  0x9e   : > { %3849 = vmatprep.subr.bf16.mxu0 %v4643_v50  ;;  %v3853_v30 = vpack.c.bf16 %v1303_v29, %v1302_v28 }
  0xa0   : > { %3815 = vmatpush3.bf16.msra.mxu1 %v3814_v31  ;;  %v1304_v31 = vld [vmem:[#allocation6 + $0x10] sm:$0xff] }
  0xa1   : > { %3817 = vmatprep.subr.bf16.mxu1 %v3816_v42  ;;  %3851 = vmatpush3.bf16.msra.mxu0 %v4645_v54  ;;  %v3856_v37 = vpack.c.bf16 %v1305_v32, %v1304_v31  ;;  %v944_v42 = vunpack.c.l.s4 %v4269_v41 }
  0xa3   : > { %v945_v45 = vunpack.c.0.s8 %v944_v42 }
  0xa4   : > { %3819 = vmatpush3.bf16.msra.mxu1 %v3818_v47 }
  0xa5   : > { %3852 = vmatprep.subr.bf16.mxu1 %v4267_v34 }
 0x123   : > { %v622_v21 = vpop.xlane.xlu0 %621 }
 0x124   : > { %v624_v22 = vmul.f32 0.03125, %v622_v21 }
 0x126   : > { %v4687_v25 = vsub.f32 %v616_v55, %v624_v22  ;;  %v4698_v55 = vsub.s32 %v945_v45, %v4658_v58 }
 0x128   : > { %v626_v26 = vmul.f32 %v4687_v25, %v4687_v25 }
 0x12a   : > { %v627_v27 = vsel %vm619_vm0, %v626_v26, 0.0 }
 0x15a   : > { %v738_v3 = vpop.f32.mrb[0].mxu1 }
 0x15b   : > { %v739_v4 = vadd.f32 %v738_v3, %v662_v63  ;;  %v740_v5 = vpop.f32.mrb[1].mxu1  ;;  %v1009_v63 = vunpack.c.0.s8 %v1008_v52 }
 0x15c   : > { %v741_v6 = vadd.f32 %v740_v5, %v666_v2 }
 0x15d   : > { %v743_v7 = vmul.f32 0.4204482, %v739_v4 }
 0x15e   : > { %v744_v8 = vmul.f32 0.4204482, %v741_v6 }
 0x15f   : > { %v847_v11 = vmul.f32 %v743_v7, %v743_v7 }
 0x160   : > { %841 = vmatprep.mubr.f32.mxu1 %v744_v8  ;;  %v848_v10 = vmul.f32 %v744_v8, %v744_v8 }
 0x161   : > { %842 = vmatmul.mubr.f32.vlgmr.msra.gmra.mrb[2].mxu1 %v743_v7 }
 0x162   : > { %913 = vmatprep.mubr.f32.mxu0 %v848_v10  ;;  %3581 = vmatprep.mubr.msk.f32.mxu1 %vm4268_vm1, %v4259_v0 }
 0x163   : > { %914 = vmatmul.mubr.f32.vlgmr.msra.gmra.mrb[0].mxu0 %v847_v11  ;;  %3854 = vmatpush3.bf16.msra.mxu1 %v3853_v30 }
 0x164   : > { %3855 = vmatprep.subr.bf16.mxu1 %v4267_v34 }
 0x167   : > { %3857 = vmatpush3.bf16.msra.mxu1 %v3856_v37 }
 0x168   : > { %3858 = vmatprep.subr.bf16.mxu1 %v4267_v34 }
 0x234   : > { %v3362_v13 = vpop.f32.mrb[2].mxu1 }
 0x235   : > { %v3363_v14 = vpop.f32.mrb[3].mxu1 }
 0x236   : > { %v4669_v15 = vadd.f32 %v3363_v14, %v3362_v13  ;;  %v3397_v16 = vpop.f32.mrb[0].mxu0  ;;  %v4706_v13 = vsub.s32 %v1009_v63, %v4658_v58 }
 0x237   : > { %v3398_v17 = vpop.f32.mrb[1].mxu0 }
 0x238   : > { %v4671_v19 = vadd.f32 %v3398_v17, %v3397_v16  ;;  %923 = vrot.lane.b32.xlu1 %v4669_v15, %s4260_s28  ;;  %920 = vrot.lane.b32.xlu0 %v4669_v15, %s4261_s22 }
 0x23c   : > { %926 = vrot.lane.b32.xlu1 %v4669_v15, %s4262_s20 }
 0x240   : > { %929 = vrot.lane.b32.xlu1 %v4669_v15, %s4263_s17 }
 0x244   : > { %932 = vrot.lane.b32.xlu1 %v4669_v15, %s4264_s16 }
 0x248   : > { %935 = vrot.lane.b32.xlu1 %v4669_v15, %s4265_s5 }
 0x24c   : > { %938 = vrot.lane.b32.xlu1 %v4669_v15, %s4266_s18 }
 0x270   : > { %628 = vadd.xlane.f32.xlu1 %v627_v27 }
 0x2aa   : > { %v924_v38 = vpop.permute.xlu1 %923  ;;  %v921_v48 = vpop.permute.xlu0 %920 }
 0x2ab   : > { %v941_v56 = vcombine.low %v4669_v15, %v924_v38  ;;  %v942_v2 = vcombine.high %v4669_v15, %v924_v38 }
 0x2ad   : > { %v949_v6 = vrot.slane %v941_v56, %v4698_v55  ;;  %v956_v14 = vrot.slane %v942_v2, %v4698_v55 }
 0x2ae   : > { %v927_v40 = vpop.permute.xlu1 %926 }
 0x2af   : > { %v957_v53 = vcombine.low %v921_v48, %v927_v40  ;;  %v958_v60 = vcombine.high %v921_v48, %v927_v40 }
 0x2b1   : > { %v965_v3 = vrot.slane %v957_v53, %v4698_v55  ;;  %v972_v8 = vrot.slane %v958_v60, %v4698_v55 }
 0x2b2   : > { %v930_v44 = vpop.permute.xlu1 %929 }
 0x2b3   : > { %v1005_v16 = vcombine.low %v949_v6, %v965_v3  ;;  %v1006_v17 = vcombine.high %v949_v6, %v965_v3  ;;  %v1021_v28 = vcombine.low %v956_v14, %v972_v8 }
 0x2b5   : > { %v1020_v37 = vrot.slane %v1006_v17, %v4706_v13  ;;  %v1013_v40 = vrot.slane %v1005_v16, %v4706_v13  ;;  %v1029_v48 = vrot.slane %v1021_v28, %v4706_v13 }
 0x2b6   : > { %v933_v47 = vpop.permute.xlu1 %932 }
 0x2ba   : > { %v936_v57 = vpop.permute.xlu1 %935 }
 0x2bb   : > { %v973_v4 = vcombine.low %v930_v44, %v936_v57  ;;  %v974_v5 = vcombine.high %v930_v44, %v936_v57  ;;  %v1022_v44 = vcombine.high %v956_v14, %v972_v8 }
 0x2bd   : > { %v981_v21 = vrot.slane %v973_v4, %v4698_v55  ;;  %v988_v22 = vrot.slane %v974_v5, %v4698_v55  ;;  %v1036_v60 = vrot.slane %v1022_v44, %v4706_v13 }
 0x2be   : > { %v939_v7 = vpop.permute.xlu1 %938 }
 0x2bf   : > { %v989_v10 = vcombine.low %v933_v47, %v939_v7  ;;  %v990_v11 = vcombine.high %v933_v47, %v939_v7 }
 0x2c1   : > { %v997_v26 = vrot.slane %v989_v10, %v4698_v55  ;;  %v1004_v27 = vrot.slane %v990_v11, %v4698_v55 }
 0x2c3   : > { %v1037_v29 = vcombine.low %v981_v21, %v997_v26  ;;  %v1038_v30 = vcombine.high %v981_v21, %v997_v26  ;;  %v1053_v31 = vcombine.low %v988_v22, %v1004_v27  ;;  %v1054_v32 = vcombine.high %v988_v22, %v1004_v27  ;;  %v3237_v22 = vld [vmem:[%s5330_s11] ss:$0 sm:$0xff] }
 0x2c4   : > { %v3238_v27 = vld [vmem:[%s5331_s12] ss:$0 sm:$0xff] }
 0x2c5   : > { %v1052_v38 = vrot.slane %v1038_v30, %v4706_v13  ;;  %v1045_v41 = vrot.slane %v1037_v29, %v4706_v13  ;;  %v1061_v42 = vrot.slane %v1053_v31, %v4706_v13  ;;  %v1068_v49 = vrot.slane %v1054_v32, %v4706_v13 }
 0x2c7   : > { %v1071_v45 = vcombine.low %v1020_v37, %v1052_v38  ;;  %v1069_v47 = vcombine.low %v1013_v40, %v1045_v41  ;;  %v1073_v56 = vcombine.low %v1029_v48, %v1061_v42  ;;  %v1070_v57 = vcombine.high %v1013_v40, %v1045_v41 }
 0x2c8   : > { %v1075_v3 = vcombine.low %v1036_v60, %v1068_v49  ;;  %v1072_v4 = vcombine.high %v1020_v37, %v1052_v38  ;;  %v1074_v7 = vcombine.high %v1029_v48, %v1061_v42  ;;  %v1076_v10 = vcombine.high %v1036_v60, %v1068_v49 }
 0x2c9   : > { %v1084_v52 = vsel %vm1077_vm2, %v1071_v45, -inf  ;;  %v1078_v53 = vsel %vm1077_vm2, %v1069_v47, -inf  ;;  %v1090_v63 = vsel %vm1077_vm2, %v1073_v56, -inf  ;;  %v1081_v2 = vsel %vm1077_vm2, %v1070_v57, -inf }
 0x2ca   : > { %1085 = vmax.xlane.f32.xlu1 %v1084_v52  ;;  %1079 = vmax.xlane.f32.xlu0 %v1078_v53  ;;  %v1096_v5 = vsel %vm1077_vm2, %v1075_v3, -inf  ;;  %v1087_v6 = vsel %vm1077_vm2, %v1072_v4, -inf  ;;  %v1093_v8 = vsel %vm1077_vm2, %v1074_v7, -inf  ;;  %v1099_v11 = vsel %vm1077_vm2, %v1076_v10, -inf }
 0x2ce   : > { %1091 = vmax.xlane.f32.xlu1 %v1090_v63  ;;  %1082 = vmax.xlane.f32.xlu0 %v1081_v2 }
 0x2d2   : > { %1097 = vmax.xlane.f32.xlu1 %v1096_v5  ;;  %1088 = vmax.xlane.f32.xlu0 %v1087_v6 }
 0x2d6   : > { %1094 = vmax.xlane.f32.xlu0 %v1093_v8 }
 0x2da   : > { %1100 = vmax.xlane.f32.xlu0 %v1099_v11 }
 0x2fd   : > { %v629_v14 = vpop.xlane.xlu1 %628 }
 0x2fe   : > { %v630_v16 = vmul.f32 0.03125, %v629_v14 }
 0x300   : > { %v631_v17 = vadd.f32 1e-05, %v630_v16 }
 0x302   : > { %4105 = vrsqrt.f32 %v631_v17 }
 0x30c   : > { %v4106_v21 = vpop.eup %4105 }
 0x30d   : > { %v633_v26 = vmul.f32 %v4106_v21, %v4687_v25 }
 0x30f   : > { %v640_v28 = vmul.f32 %v3237_v22, %v633_v26 }
 0x311   : > { %v4736_v29 = vadd.f32 %v3238_v27, %v640_v28 }
 0x313   : > { %v648_v30 = vmax.f32 %v4736_v29, 0.0 }
 0x315   : > { %3582 = vmatmul.mubr.msk.f32.vlgmr.msra.gmra.mrb[4].mxu1 %vm619_vm0, %v648_v30 }
 0x316   : > { %3614 = vmatprep.mubr.msk.f32.mxu1 %vm4268_vm1, %v4259_v0 }
 0x357   : > { %v1080_v31 = vpop.xlane.xlu0 %1079  ;;  %v1086_v32 = vpop.xlane.xlu1 %1085 }
 0x35b   : > { %v1083_v37 = vpop.xlane.xlu0 %1082  ;;  %v1092_v25 = vpop.xlane.xlu1 %1091 }
 0x35c   : > { %v1102_v45 = vmax.f32 %v1080_v31, %v1092_v25 }
 0x35f   : > { %v1089_v38 = vpop.xlane.xlu0 %1088  ;;  %v1098_v41 = vpop.xlane.xlu1 %1097 }
 0x360   : > { %v1104_v47 = vmax.f32 %v1086_v32, %v1098_v41 }
 0x363   : > { %v1095_v40 = vpop.xlane.xlu0 %1094 }
 0x364   : > { %v1103_v42 = vmax.f32 %v1083_v37, %v1095_v40 }
 0x366   : > { %v1106_v49 = vmax.f32 %v1102_v45, %v1103_v42 }
 0x367   : > { %v1101_v44 = vpop.xlane.xlu0 %1100 }
 0x368   : > { %v1105_v48 = vmax.f32 %v1089_v38, %v1101_v44 }
 0x36a   : > { %v1107_v52 = vmax.f32 %v1104_v47, %v1105_v48 }
 0x36c   : > { %v1108_v53 = vmax.f32 %v1106_v49, %v1107_v52 }
 0x36e   : > { %v1116_v56 = vsel %vm1111_vm3, %v1092_v25, %v1108_v53  ;;  %v1117_v57 = vsel %vm1111_vm3, %v1095_v40, %v1108_v53  ;;  %v1118_v60 = vsel %vm1111_vm3, %v1098_v41, %v1108_v53  ;;  %v1119_v63 = vsel %vm1111_vm3, %v1101_v44, %v1108_v53 }
 0x36f   : > { %v1152_v2 = vcombine.low %v1116_v56, %v1118_v60  ;;  %v1153_v3 = vcombine.high %v1116_v56, %v1118_v60  ;;  %v1168_v4 = vcombine.low %v1117_v57, %v1119_v63  ;;  %v1169_v5 = vcombine.high %v1117_v57, %v1119_v63 }
 0x370   : > { %v1112_v6 = vsel %vm1111_vm3, %v1080_v31, %v1108_v53  ;;  %v1113_v7 = vsel %vm1111_vm3, %v1083_v37, %v1108_v53  ;;  %v1114_v8 = vsel %vm1111_vm3, %v1086_v32, %v1108_v53  ;;  %v1115_v10 = vsel %vm1111_vm3, %v1089_v38, %v1108_v53 }
 0x371   : > { %v1160_v11 = vrot.slane %v1152_v2, %v4698_v55  ;;  %v1167_v14 = vrot.slane %v1153_v3, %v4698_v55  ;;  %v1176_v16 = vrot.slane %v1168_v4, %v4698_v55  ;;  %v1183_v17 = vrot.slane %v1169_v5, %v4698_v55 }
 0x372   : > { %v1120_v21 = vcombine.low %v1112_v6, %v1114_v8  ;;  %v1136_v22 = vcombine.low %v1113_v7, %v1115_v10  ;;  %v1121_v26 = vcombine.high %v1112_v6, %v1114_v8  ;;  %v1137_v27 = vcombine.high %v1113_v7, %v1115_v10 }
 0x373   : > { %v1216_v28 = vcombine.low %v1160_v11, %v1176_v16  ;;  %v1217_v31 = vcombine.high %v1160_v11, %v1176_v16  ;;  %v1232_v40 = vcombine.low %v1167_v14, %v1183_v17  ;;  %v1233_v52 = vcombine.high %v1167_v14, %v1183_v17  ;;  %v3240_v11 = vld [vmem:[%s5326_s7] ss:$0 sm:$0xff] }
 0x374   : > { %v1128_v37 = vrot.slane %v1120_v21, %v4698_v55  ;;  %v1144_v32 = vrot.slane %v1136_v22, %v4698_v55  ;;  %v1135_v25 = vrot.slane %v1121_v26, %v4698_v55  ;;  %v1151_v38 = vrot.slane %v1137_v27, %v4698_v55 }
 0x375   : > { %v1231_v41 = vrot.slane %v1217_v31, %v4706_v13  ;;  %v1224_v45 = vrot.slane %v1216_v28, %v4706_v13  ;;  %v1240_v53 = vrot.slane %v1232_v40, %v4706_v13  ;;  %v1247_v6 = vrot.slane %v1233_v52, %v4706_v13 }
 0x376   : > { %v1185_v42 = vcombine.high %v1128_v37, %v1144_v32  ;;  %v1184_v44 = vcombine.low %v1128_v37, %v1144_v32  ;;  %v1200_v47 = vcombine.low %v1135_v25, %v1151_v38  ;;  %v1201_v63 = vcombine.high %v1135_v25, %v1151_v38 }
 0x378   : > { %v1199_v48 = vrot.slane %v1185_v42, %v4706_v13  ;;  %v1192_v49 = vrot.slane %v1184_v44, %v4706_v13  ;;  %v1208_v60 = vrot.slane %v1200_v47, %v4706_v13  ;;  %v1215_v5 = vrot.slane %v1201_v63, %v4706_v13 }
 0x37a   : > { %v1250_v56 = vcombine.low %v1199_v48, %v1231_v41  ;;  %v1249_v57 = vcombine.high %v1192_v49, %v1224_v45  ;;  %v1248_v2 = vcombine.low %v1192_v49, %v1224_v45  ;;  %v1253_v3 = vcombine.high %v1208_v60, %v1240_v53 }
 0x37b   : > { %v1251_v4 = vcombine.high %v1199_v48, %v1231_v41  ;;  %v1255_v7 = vcombine.high %v1215_v5, %v1247_v6  ;;  %v1252_v8 = vcombine.low %v1208_v60, %v1240_v53  ;;  %v1254_v10 = vcombine.low %v1215_v5, %v1247_v6  ;;  %v4806_v5 = vld [vmem:[#allocation7 + $0x8] sm:$0xff] }
 0x37c   : > { %1261 = vrot.lane.b32.xlu0 %v1250_v56, %s4265_s5  ;;  %1257 = vrot.lane.b32.xlu1 %v1249_v57, %s4266_s18  ;;  %v1296_v41 = vsub.f32 %v4669_v15, %v4671_v19 }
 0x380   : > { %1273 = vrot.lane.b32.xlu0 %v1253_v3, %s4262_s20  ;;  %1265 = vrot.lane.b32.xlu1 %v1251_v4, %s4264_s16  ;;  %v4804_v4 = vld [vmem:[#allocation7] sm:$0xff] }
 0x384   : > { %1281 = vrot.lane.b32.xlu0 %v1255_v7, %s4261_s22  ;;  %1269 = vrot.lane.b32.xlu1 %v1252_v8, %s4263_s17  ;;  %v4811_v7 = vpack.c.bf16 %v4806_v5, %v4804_v4  ;;  %v4813_v8 = vld [vmem:[#allocation7 + $0x10] sm:$0xff] }
 0x388   : > { %1277 = vrot.lane.b32.xlu1 %v1254_v10, %s4260_s28  ;;  %v4815_v10 = vld [vmem:[#allocation7 + $0x18] sm:$0xff] }
 0x3e8   : > { %v1382_v14 = vpop.f32.mrb[4].mxu1 }
 0x3e9   : > { %v1383_v16 = vadd.f32 %v3240_v11, %v1382_v14  ;;  %v3583_v17 = vpop.f32.mrb[5].mxu1  ;;  %v4821_v14 = vpack.c.bf16 %v4815_v10, %v4813_v8 }
 0x3ea   : > { %v4826_v17 = vld [vmem:[#allocation7 + $0x28] sm:$0xff] }
 0x3eb   : > { %3584 = vmatprep.subr.mxu0 %v1383_v16 }
 0x3ec   : > { %3585 = vmatpush3.msra.mxu0 %v1383_v16  ;;  %v4824_v16 = vld [vmem:[#allocation7 + $0x20] sm:$0xff] }
 0x3ed   : > { %3870 = vmatprep.subr.bf16.mxu0 %v4267_v34 }
 0x3ee   : > { %v1258_v21 = vpop.permute.xlu1 %1257  ;;  %v1262_v22 = vpop.permute.xlu0 %1261 }
 0x3ef   : > { %v1284_v26 = vsel %vm1077_vm2, %v1248_v2, %v1258_v21 }
 0x3f0   : > { %v1285_v31 = vsel %vm619_vm0, %v1284_v26, %v1262_v22  ;;  %v4832_v22 = vpack.c.bf16 %v4826_v17, %v4824_v16  ;;  %v4835_v26 = vld [vmem:[#allocation7 + $0x30] sm:$0xff] }
 0x3f2   : > { %v1266_v27 = vpop.permute.xlu1 %1265  ;;  %v1274_v28 = vpop.permute.xlu0 %1273 }
 0x3f3   : > { %v1287_v37 = vsel %vm1286_vm4, %v1285_v31, %v1266_v27  ;;  %v4837_v27 = vld [vmem:[#allocation7 + $0x38] sm:$0xff]  ;;  %v1848_v31 = vld [vmem:[#allocation2 + $0x48] sm:$0xff] }
 0x3f6   : > { %v1270_v32 = vpop.permute.xlu1 %1269  ;;  %v1282_v42 = vpop.permute.xlu0 %1281 }
 0x3f7   : > { %v1289_v25 = vsel %vm1288_vm5, %v1287_v37, %v1270_v32  ;;  %v1850_v37 = vld [vmem:[#allocation2 + $0x58] sm:$0xff]  ;;  %v4843_v32 = vpack.c.bf16 %v4837_v27, %v4835_v26 }
 0x3f8   : > { %v1291_v40 = vsel %vm1290_vm6, %v1289_v25, %v1274_v28  ;;  %v3906_v25 = vpack.c.bf16 %v1850_v37, %v1848_v31  ;;  %v3261_v37 = vld [vmem:[%s5323_s4 + $0x110] sm:$0xff] }
 0x3fa   : > { %v1278_v38 = vpop.permute.xlu1 %1277 }
 0x3fb   : > { %v1293_v44 = vsel %vm1292_vm7, %v1291_v40, %v1278_v38 }
 0x3fc   : > { %v1295_v45 = vsel %vm1294_vm8, %v1293_v44, %v1282_v42  ;;  %v1847_v42 = vld [vmem:[#allocation2 + $0x40] sm:$0xff]  ;;  %v1849_v44 = vld [vmem:[#allocation2 + $0x50] sm:$0xff] }
 0x3fd   : > { %v1297_v47 = vsub.f32 %v1296_v41, %v1295_v45 }
 0x3ff   : > { %v1298_v48 = vmul.f32 1.442695, %v1297_v47 }
 0x401   : > { %4107 = vpow2.f32 %v1298_v48  ;;  %v1852_v48 = vld [vmem:[#allocation2 + $0x68] sm:$0xff] }
 0x40b   : > { %v4108_v49 = vpop.eup %4107 }
 0x40c   : > { %v1300_v52 = vadd.f32 1e-06, %v4108_v49  ;;  %v1854_v49 = vld [vmem:[#allocation2 + $0x78] sm:$0xff] }
 0x40e   : > { %v4797_v53 = vmul.f32 0.25, %v1300_v52  ;;  %v3908_v52 = vpack.c.bf16 %v1849_v44, %v1847_v42  ;;  %v3263_v44 = vld [vmem:[%s5323_s4 + $0x120] sm:$0xff] }
 0x410   : > { %1387 = vrot.lane.b32.xlu1 %v4797_v53, %s4263_s17  ;;  %v1633_v56 = vsel %vm1632_vm9, %v4797_v53, 0.0 }
 0x411   : > { %v1634_v15 = vrot.slane %v1633_v56, 4 }
 0x413   : > { %v1635_v19 = vadd.f32 %v1634_v15, %v1633_v56  ;;  %v3910_v15 = vpack.c.bf16 %v1854_v49, %v1852_v48  ;;  %v3282_v48 = vld [vmem:[%s5323_s4 + $0x1b8] sm:$0xff] }
 0x415   : > { %v1636_v57 = vrot.slane %v1635_v19, 2 }
 0x417   : > { %v1637_v60 = vadd.f32 %v1636_v57, %v1635_v19  ;;  %v1851_v19 = vld [vmem:[#allocation2 + $0x60] sm:$0xff]  ;;  %v1853_v57 = vld [vmem:[#allocation2 + $0x70] sm:$0xff] }
 0x419   : > { %v1638_v63 = vrot.slane %v1637_v60, 1 }
 0x41b   : > { %v1639_v2 = vadd.f32 %v1638_v63, %v1637_v60  ;;  %v3912_v60 = vpack.c.bf16 %v1853_v57, %v1851_v19  ;;  %v3275_v63 = vld [vmem:[%s5323_s4 + $0x180] sm:$0xff]  ;;  %v3284_v57 = vld [vmem:[%s5323_s4 + $0x1c8] sm:$0xff] }
 0x41c   : > { %v3283_v19 = vld [vmem:[%s5323_s4 + $0x1c0] sm:$0xff] }
 0x41d   : > { %1641 = vrot.lane.b32.xlu1 %v1639_v2, %s4263_s17  ;;  %v3276_v2 = vld [vmem:[%s5323_s4 + $0x188] sm:$0xff] }
 0x482   : > { %v1388_v3 = vpop.permute.xlu1 %1387 }
 0x483   : > { %1390 = vxpose.xlu0.b32.start.end [1/1] (short) (narrow) %v1388_v3, 64  ;;  %v3259_v3 = vld [vmem:[%s5323_s4 + $0x100] sm:$0xff] }
 0x48f   : > { %v1642_v45 = vpop.permute.xlu1 %1641 }
 0x490   : > { %v1644_v56 = vmul.f32 %v1642_v45, %v4797_v53  ;;  %v3264_v45 = vld [vmem:[%s5323_s4 + $0x128] sm:$0xff] }
 0x491   : > { %v3924_v49 = vpack.c.bf16 %v3264_v45, %v3263_v44  ;;  %v3289_v44 = vld [vmem:[%s5323_s4 + $0x1f0] sm:$0xff]  ;;  %v3290_v45 = vld [vmem:[%s5323_s4 + $0x1f8] sm:$0xff] }
 0x503   : > { %v1406_v6 = vpop.trf.xlu0 }
 0x504   : > { %3586 = vmatprep.mubr.msk.f32.mxu0 %vm1422_vm10, %v1406_v6  ;;  %v3914_v6 = vpack.c.bf16 %v3276_v2, %v3275_v63  ;;  %v3930_v63 = vpack.c.bf16 %v3284_v57, %v3283_v19  ;;  %v3267_v2 = vld [vmem:[%s5323_s4 + $0x140] sm:$0xff] }
 0x507   : > { %v1407_v11 = vpop.trf.xlu0 }
 0x508   : > { %3587 = vmatmul.mubr.msk.f32.vlgmr.msra.gmra.mrb[2].mxu0 %vm1422_vm10, %v1407_v11  ;;  %v3260_v11 = vld [vmem:[%s5323_s4 + $0x108] sm:$0xff] }
 0x509   : > { %3872 = vmatpush3.bf16.msra.mxu0 %v4811_v7 }
 0x50a   : > { %3873 = vmatprep.subr.bf16.mxu0 %v4267_v34 }
 0x50b   : > { %v1408_v21 = vpop.trf.xlu0 }
 0x50c   : > { %3589 = vmatprep.mubr.msk.f32.mxu0 %vm1422_vm10, %v1408_v21  ;;  %v3278_v21 = vld [vmem:[%s5323_s4 + $0x198] sm:$0xff] }
 0x50d   : > { %3875 = vmatpush3.bf16.msra.mxu0 %v4821_v14 }
 0x50e   : > { %3876 = vmatprep.subr.bf16.mxu0 %v4267_v34 }
 0x50f   : > { %v1409_v28 = vpop.trf.xlu0 }
 0x510   : > { %3590 = vmatmul.mubr.msk.f32.gmra.mrb[4].mxu0 %vm1422_vm10, %v1409_v28  ;;  %v3916_v28 = vpack.c.bf16 %v3260_v11, %v3259_v3  ;;  %v3268_v3 = vld [vmem:[%s5323_s4 + $0x148] sm:$0xff]  ;;  %v3286_v11 = vld [vmem:[%s5323_s4 + $0x1d8] sm:$0xff] }
 0x511   : > { %3878 = vmatpush3.bf16.msra.mxu0 %v4832_v22 }
 0x512   : > { %3879 = vmatprep.subr.bf16.mxu0 %v4267_v34 }
 0x513   : > { %v1410_v38 = vpop.trf.xlu0 }
 0x514   : > { %3592 = vmatprep.mubr.msk.f32.mxu0 %vm1422_vm10, %v1410_v38  ;;  %v3279_v38 = vld [vmem:[%s5323_s4 + $0x1a0] sm:$0xff] }
 0x515   : > { %3881 = vmatpush3.bf16.msra.mxu0 %v4843_v32 }
 0x516   : > { %3907 = vmatprep.subr.bf16.mxu0 %v3906_v25  ;;  %v3262_v25 = vld [vmem:[%s5323_s4 + $0x118] sm:$0xff] }
 0x517   : > { %v1411_v40 = vpop.trf.xlu0 }
 0x518   : > { %3593 = vmatmul.mubr.msk.f32.gmra.mrb[6].mxu0 %vm1422_vm10, %v1411_v40  ;;  %v3280_v40 = vld [vmem:[%s5323_s4 + $0x1a8] sm:$0xff] }
 0x519   : > { %v3922_v42 = vpack.c.bf16 %v3280_v40, %v3279_v38 }
 0x51b   : > { %v1412_v41 = vpop.trf.xlu0 }
 0x51c   : > { %3595 = vmatprep.mubr.msk.f32.mxu0 %vm1422_vm10, %v1412_v41  ;;  %v3920_v41 = vpack.c.bf16 %v3262_v25, %v3261_v37  ;;  %v3287_v37 = vld [vmem:[%s5323_s4 + $0x1e0] sm:$0xff]  ;;  %v3288_v25 = vld [vmem:[%s5323_s4 + $0x1e8] sm:$0xff] }
 0x51d   : > { %v3938_v40 = vpack.c.bf16 %v3288_v25, %v3287_v37 }
 0x51f   : > { %v1413_v47 = vpop.trf.xlu0 }
 0x520   : > { %3596 = vmatmul.mubr.msk.f32.gmra.mrb[8].mxu0 %vm1422_vm10, %v1413_v47  ;;  %v3281_v47 = vld [vmem:[%s5323_s4 + $0x1b0] sm:$0xff] }
 0x521   : > { %3633 = vmatprep.mubr.msk.f32.mxu0 %vm4268_vm1, %v4259_v0 }
 0x524   : > { %3634 = vmatmul.mubr.msk.f32.vlgmr.msra.gmra.mrb[10].mxu0 %vm1288_vm5, %v1644_v56  ;;  %v3265_v56 = vld [vmem:[%s5323_s4 + $0x130] sm:$0xff] }
 0x525   : > { %3909 = vmatpush1.bf16.msra.mxu0 %v3908_v52  ;;  %1932 = vmatprep.mubr.f32.mxu0 %v4259_v0  ;;  %v3926_v52 = vpack.c.bf16 %v3282_v48, %v3281_v47  ;;  %v3942_v48 = vpack.c.bf16 %v3290_v45, %v3289_v44  ;;  %v1720_v44 = vld [vmem:[%s5328_s9] sm:$0xff]  ;;  %v1721_v45 = vld [vmem:[%s5328_s9 + $0x8] sm:$0xff] }
 0x526   : > { %3911 = vmatprep.subr.bf16.mxu0 %v3910_v15  ;;  %v3266_v15 = vld [vmem:[%s5323_s4 + $0x138] sm:$0xff] }
 0x529   : > { %3913 = vmatpush1.bf16.msra.mxu0 %v3912_v60  ;;  %v3928_v60 = vpack.c.bf16 %v3266_v15, %v3265_v56 }
 0x52a   : > { %3915 = vmatprep.subr.bf16.mxu0 %v3914_v6  ;;  %v3285_v6 = vld [vmem:[%s5323_s4 + $0x1d0] sm:$0xff] }
 0x52c   : > { %3258 = vmatmul.mubr.msk.f32.vlgmr.msra.gmra.mrb[12].mxu0 %vm619_vm0, %v4515_v23  ;;  %v3277_v23 = vld [vmem:[%s5323_s4 + $0x190] sm:$0xff] }
 0x52d   : > { %v3918_v31 = vpack.c.bf16 %v3278_v21, %v3277_v23  ;;  %3917 = vmatpush3.bf16.msra.mxu0 %v3916_v28  ;;  %v3932_v23 = vpack.c.bf16 %v3268_v3, %v3267_v2  ;;  %v3934_v21 = vpack.c.bf16 %v3286_v11, %v3285_v6  ;;  %v3269_v28 = vld [vmem:[%s5323_s4 + $0x150] sm:$0xff] }
 0x52f   : > { %3919 = vmatprep.subr.bf16.mxu0 %v3918_v31  ;;  %v3270_v31 = vld [vmem:[%s5323_s4 + $0x158] sm:$0xff] }
 0x530   : > { %v3936_v38 = vpack.c.bf16 %v3270_v31, %v3269_v28 }
 0x531   : > { %3921 = vmatpush3.bf16.msra.mxu0 %v3920_v41  ;;  %v3271_v41 = vld [vmem:[%s5323_s4 + $0x160] sm:$0xff] }
 0x532   : > { %3923 = vmatprep.subr.bf16.mxu0 %v3922_v42  ;;  %v3272_v42 = vld [vmem:[%s5323_s4 + $0x168] sm:$0xff] }
 0x533   : > { %v3940_v47 = vpack.c.bf16 %v3272_v42, %v3271_v41 }
 0x535   : > { %3925 = vmatpush3.bf16.msra.mxu0 %v3924_v49  ;;  %v3273_v49 = vld [vmem:[%s5323_s4 + $0x170] sm:$0xff] }
 0x536   : > { %3927 = vmatprep.subr.bf16.mxu0 %v3926_v52  ;;  %v3274_v52 = vld [vmem:[%s5323_s4 + $0x178] sm:$0xff] }
 0x537   : > { %v3944_v56 = vpack.c.bf16 %v3274_v52, %v3273_v49  ;;  %v3257_v52 = vld [vmem:[%s5322_s3 + $0x2] sm:$0x3] }
 0x539   : > { %3929 = vmatpush3.bf16.msra.mxu0 %v3928_v60 }
 0x53a   : > { %3931 = vmatprep.subr.bf16.mxu0 %v3930_v63 }
 0x53d   : > { %3933 = vmatpush3.bf16.msra.mxu0 %v3932_v23 }
 0x53e   : > { %3935 = vmatprep.subr.bf16.mxu0 %v3934_v21 }
 0x541   : > { %3937 = vmatpush3.bf16.msra.mxu0 %v3936_v38 }
 0x542   : > { %3939 = vmatprep.subr.bf16.mxu0 %v3938_v40 }
 0x545   : > { %3941 = vmatpush3.bf16.msra.mxu0 %v3940_v47 }
 0x546   : > { %3943 = vmatprep.subr.bf16.mxu0 %v3942_v48 }
 0x549   : > { %3945 = vmatpush3.bf16.msra.mxu0 %v3944_v56  ;;  %v3883_v56 = vpack.c.bf16 %v1721_v45, %v1720_v44  ;;  %v1732_v45 = vld [vmem:[%s5328_s9 + $0x60] sm:$0xff] }
 0x54a   : > { %3978 = vmatprep.subr.bf16.mxu0 %v4267_v34 }
 0x5db   : > { %v3588_v15 = vpop.f32.mrb[2].mxu0 }
 0x5dc   : > { %v1553_v19 = vmul.f32 %v3588_v15, %v4806_v5  ;;  %v1513_v57 = vpop.f32.mrb[3].mxu0  ;;  %v1722_v15 = vld [vmem:[%s5328_s9 + $0x10] sm:$0xff] }
 0x5dd   : > { %v1552_v60 = vmul.f32 %v1513_v57, %v4804_v4  ;;  %v1861_v57 = vrot.slane %v3257_v52, %v661_v59 }
 0x5df   : > { %v3859_v63 = vpack.c.bf16 %v1553_v19, %v1552_v60  ;;  %v1723_v19 = vld [vmem:[%s5328_s9 + $0x18] sm:$0xff]  ;;  %v1865_v60 = vrot.slane %v3257_v52, %v665_v62  ;;  %v1734_v52 = vld [vmem:[%s5328_s9 + $0x70] sm:$0xff] }
 0x5e1   : > { %3860 = vmatpush3.bf16.msra.mxu1 %v3859_v63  ;;  %v3886_v63 = vpack.c.bf16 %v1723_v19, %v1722_v15 }
 0x5e2   : > { %3861 = vmatprep.subr.bf16.mxu1 %v4267_v34 }
 0x5e3   : > { %v3591_v2 = vpop.f32.mrb[4].mxu0 }
 0x5e4   : > { %v1555_v3 = vmul.f32 %v3591_v2, %v4815_v10  ;;  %v1523_v6 = vpop.f32.mrb[5].mxu0  ;;  %v1724_v2 = vld [vmem:[%s5328_s9 + $0x20] sm:$0xff] }
 0x5e5   : > { %v1554_v11 = vmul.f32 %v1523_v6, %v4813_v8 }
 0x5e7   : > { %v3862_v23 = vpack.c.bf16 %v1555_v3, %v1554_v11 }
 0x5e9   : > { %3863 = vmatpush3.bf16.msra.mxu1 %v3862_v23 }
 0x5ea   : > { %3864 = vmatprep.subr.bf16.mxu1 %v4267_v34 }
 0x5eb   : > { %v3594_v21 = vpop.f32.mrb[6].mxu0 }
 0x5ec   : > { %v1557_v28 = vmul.f32 %v3594_v21, %v4826_v17  ;;  %v1533_v31 = vpop.f32.mrb[7].mxu0  ;;  %v1726_v21 = vld [vmem:[%s5328_s9 + $0x30] sm:$0xff] }
 0x5ed   : > { %v1556_v37 = vmul.f32 %v1533_v31, %v4824_v16 }
 0x5ef   : > { %v3865_v25 = vpack.c.bf16 %v1557_v28, %v1556_v37  ;;  %v1727_v28 = vld [vmem:[%s5328_s9 + $0x38] sm:$0xff] }
 0x5f0   : > { %v3892_v37 = vpack.c.bf16 %v1727_v28, %v1726_v21 }
 0x5f1   : > { %3866 = vmatpush3.bf16.msra.mxu1 %v3865_v25  ;;  %v1728_v25 = vld [vmem:[%s5328_s9 + $0x40] sm:$0xff] }
 0x5f2   : > { %3867 = vmatprep.subr.bf16.mxu1 %v4267_v34 }
 0x5f3   : > { %v3597_v38 = vpop.f32.mrb[8].mxu0 }
 0x5f4   : > { %v1559_v40 = vmul.f32 %v3597_v38, %v4837_v27  ;;  %v1543_v41 = vpop.f32.mrb[9].mxu0  ;;  %v1729_v38 = vld [vmem:[%s5328_s9 + $0x48] sm:$0xff] }
 0x5f5   : > { %v1558_v42 = vmul.f32 %v1543_v41, %v4835_v26  ;;  %v1730_v41 = vld [vmem:[%s5328_s9 + $0x50] sm:$0xff] }
 0x5f7   : > { %v3868_v47 = vpack.c.bf16 %v1559_v40, %v1558_v42  ;;  %v1714_v48 = vpop.f32.mrb[10].mxu0  ;;  %v3895_v40 = vpack.c.bf16 %v1729_v38, %v1728_v25  ;;  %v1731_v42 = vld [vmem:[%s5328_s9 + $0x58] sm:$0xff] }
 0x5f8   : > { %v3635_v49 = vpop.f32.mrb[11].mxu0  ;;  %v3898_v44 = vpack.c.bf16 %v1731_v42, %v1730_v41  ;;  %4109 = vrcp.f32 %v1714_v48 }
 0x5f9   : > { %3869 = vmatpush3.bf16.msra.mxu1 %v3868_v47  ;;  %v1733_v47 = vld [vmem:[%s5328_s9 + $0x68] sm:$0xff] }
 0x5fa   : > { %3882 = vmatprep.subr.bf16.mxu1 %v4267_v34  ;;  %v3901_v49 = vpack.c.bf16 %v1733_v47, %v1732_v45 }
 0x5fc   : > { %3615 = vmatmul.mubr.msk.f32.vlgmr.msra.gmra.mrb[6].mxu1 %vm1288_vm5, %v4797_v53  ;;  %v1725_v53 = vld [vmem:[%s5328_s9 + $0x28] sm:$0xff] }
 0x5fd   : > { %3884 = vmatpush3.bf16.msra.mxu1 %v3883_v56  ;;  %3668 = vmatprep.mubr.msk.f32.mxu1 %vm4268_vm1, %v4259_v0  ;;  %v3889_v62 = vpack.c.bf16 %v1725_v53, %v1724_v2  ;;  %v1735_v56 = vld [vmem:[%s5328_s9 + $0x78] sm:$0xff] }
 0x5fe   : > { %3885 = vmatprep.subr.bf16.mxu1 %v4267_v34  ;;  %v3904_v15 = vpack.c.bf16 %v1735_v56, %v1734_v52 }
 0x5ff   : > { %v1934_v3 = vpop.f32.mrb[12].mxu0 }
 0x600   : > { %v1935_v59 = vadd.f32 %v1934_v3, %v1861_v57  ;;  %v1936_v6 = vpop.f32.mrb[13].mxu0 }
 0x601   : > { %v1937_v11 = vadd.f32 %v1936_v6, %v1865_v60  ;;  %3887 = vmatpush3.bf16.msra.mxu1 %v3886_v63 }
 0x602   : > { %v1939_v23 = vmul.f32 0.4204482, %v1935_v59  ;;  %3888 = vmatprep.subr.bf16.mxu1 %v4267_v34  ;;  %v4110_v19 = vpop.eup %4109 }
 0x603   : > { %v1940_v31 = vmul.f32 0.4204482, %v1937_v11 }
 0x605   : > { %2038 = vmatprep.mubr.f32.mxu0 %v1940_v31  ;;  %3890 = vmatpush3.bf16.msra.mxu1 %v3889_v62  ;;  %v2045_v2 = vmul.f32 %v1940_v31, %v1940_v31 }
 0x606   : > { %2039 = vmatmul.mubr.f32.vlgmr.msra.gmra.mrb[14].mxu0 %v1939_v23  ;;  %3891 = vmatprep.subr.bf16.mxu1 %v4267_v34 }
 0x607   : > { %3679 = vmatprep.mubr.msk.f32.mxu0 %vm4268_vm1, %v4259_v0 }
 0x609   : > { %3893 = vmatpush3.bf16.msra.mxu1 %v3892_v37 }
 0x60a   : > { %3894 = vmatprep.subr.bf16.mxu1 %v4267_v34 }
 0x60d   : > { %3896 = vmatpush3.bf16.msra.mxu1 %v3895_v40 }
 0x60e   : > { %3897 = vmatprep.subr.bf16.mxu1 %v4267_v34 }
 0x611   : > { %3899 = vmatpush3.bf16.msra.mxu1 %v3898_v44 }
 0x612   : > { %3900 = vmatprep.subr.bf16.mxu1 %v4267_v34 }
 0x615   : > { %3902 = vmatpush3.bf16.msra.mxu1 %v3901_v49 }
 0x616   : > { %3903 = vmatprep.subr.bf16.mxu1 %v4267_v34 }
 0x619   : > { %3905 = vmatpush3.bf16.msra.mxu1 %v3904_v15 }
 0x61a   : > { %3947 = vmatprep.subr.bf16.mxu1 %v4510_v20 }
 0x6cf   : > { %v1628_v57 = vpop.f32.mrb[6].mxu1 }
 0x6d0   : > { %v1719_v60 = vmul.f32 %v4110_v19, %v1628_v57  ;;  %v3616_v63 = vpop.f32.mrb[7].mxu1 }
 0x6d2   : > { %3669 = vmatmul.mubr.f32.vlgmr.msra.gmra.mrb[8].mxu1 %v1719_v60 }
 0x6d3   : > { %3949 = vmatpush3.bf16.msra.mxu1 %v4517_v24  ;;  %2110 = vmatprep.mubr.f32.mxu1 %v2045_v2  ;;  %v2044_v24 = vmul.f32 %v1939_v23, %v1939_v23 }
 0x6d4   : > { %3951 = vmatprep.subr.bf16.mxu1 %v4533_v33  ;;  %v3252_v33 = vld [vmem:[%s5329_s10] ss:$0 sm:$0xff] }
 0x6d7   : > { %3953 = vmatpush3.bf16.msra.mxu1 %v4535_v36  ;;  %v5074_v36 = vld [vmem:[%s5332_s13] sm:$0xff] }
 0x6d8   : > { %3955 = vmatprep.subr.bf16.mxu1 %v4546_v43 }
 0x6d9   : > { %v3481_v53 = vpop.f32.mrb[14].mxu0 }
 0x6da   : > { %v3482_v3 = vpop.f32.mrb[15].mxu0 }
 0x6db   : > { %3957 = vmatpush3.bf16.msra.mxu1 %v4552_v46  ;;  %v5041_v20 = vadd.f32 %v3482_v3, %v3481_v53 }
 0x6dc   : > { %3959 = vmatprep.subr.bf16.mxu1 %v4558_v51 }
 0x6dd   : > { %2120 = vrot.lane.b32.xlu1 %v5041_v20, %s4260_s28  ;;  %2117 = vrot.lane.b32.xlu0 %v5041_v20, %s4261_s22 }
 0x6df   : > { %3961 = vmatpush3.bf16.msra.mxu1 %v4573_v61 }
 0x6e0   : > { %3963 = vmatprep.subr.bf16.mxu1 %v4579_v1 }
 0x6e3   : > { %3965 = vmatpush3.bf16.msra.mxu1 %v4588_v9 }
 0x6e4   : > { %3967 = vmatprep.subr.bf16.mxu1 %v4594_v12 }
 0x6e7   : > { %3969 = vmatpush3.bf16.msra.mxu1 %v4603_v18 }
 0x6e8   : > { %3971 = vmatprep.subr.bf16.mxu1 %v4625_v35 }
 0x6eb   : > { %3973 = vmatpush3.bf16.msra.mxu1 %v4627_v39 }
 0x6ec   : > { %3975 = vmatprep.subr.bf16.mxu1 %v4643_v50 }
 0x6ef   : > { %3977 = vmatpush3.bf16.msra.mxu1 %v4645_v54 }
 0x6f0   : > { %3996 = vmatprep.subr.bf16.mxu1 %v4267_v34 }
 0x6f2   : > { %2111 = vmatmul.mubr.f32.vlgmr.msra.gmra.mrb[10].mxu1 %v2044_v24 }
 0x6f3   : > { %3998 = vmatpush3.bf16.msra.mxu1 %v4811_v7  ;;  %3731 = vmatprep.mubr.msk.f32.mxu1 %vm4268_vm1, %v4259_v0 }
 0x6f4   : > { %3999 = vmatprep.subr.bf16.mxu1 %v4267_v34 }
 0x6f7   : > { %4001 = vmatpush3.bf16.msra.mxu1 %v4821_v14 }
 0x6f8   : > { %4002 = vmatprep.subr.bf16.mxu1 %v4267_v34 }
 0x6fb   : > { %4004 = vmatpush3.bf16.msra.mxu1 %v4832_v22 }
 0x6fc   : > { %4005 = vmatprep.subr.bf16.mxu1 %v4267_v34 }
 0x6ff   : > { %4007 = vmatpush3.bf16.msra.mxu1 %v4843_v32 }
 0x700   : > { %4032 = vmatprep.subr.bf16.mxu1 %v4267_v34 }
 0x74f   : > { %v2121_v39 = vpop.permute.xlu1 %2120  ;;  %v2118_v48 = vpop.permute.xlu0 %2117 }
 0x750   : > { %v2138_v6 = vcombine.low %v5041_v20, %v2121_v39  ;;  %v2139_v23 = vcombine.high %v5041_v20, %v2121_v39 }
 0x752   : > { %v2146_v37 = vrot.slane %v2138_v6, %v4698_v55  ;;  %v2153_v42 = vrot.slane %v2139_v23, %v4698_v55  ;;  %v2494_v6 = vld [vmem:[#allocation6 + $0x38] sm:$0xff] }
 0x7a5   : > { %v1809_v43 = vpop.f32.mrb[8].mxu1 }
 0x7a6   : > { %v1810_v46 = vadd.f32 %v3252_v33, %v1809_v43  ;;  %v3670_v51 = vpop.f32.mrb[9].mxu1 }
 0x7a8   : > { %v1813_v61 = vadd.f32 %v1810_v46, %v5074_v36 }
 0x7aa   : > { %v1814_v1 = vadd.f32 %v1813_v61, %v648_v30 }
 0x7ac   : > { %v1819_v9 = vsel %vm619_vm0, %v1814_v1, 0.0 }
 0x7ad   : > { %1820 = vadd.xlane.f32.xlu1 %v1819_v9 }
 0x7be   : > { %2123 = vrot.lane.b32.xlu1 %v5041_v20, %s4262_s20 }
 0x7c2   : > { %2126 = vrot.lane.b32.xlu1 %v5041_v20, %s4263_s17 }
 0x7c5   : > { %v3516_v12 = vpop.f32.mrb[10].mxu1 }
 0x7c6   : > { %v3517_v18 = vpop.f32.mrb[11].mxu1  ;;  %2129 = vrot.lane.b32.xlu1 %v5041_v20, %s4264_s16 }
 0x7c7   : > { %v5086_v35 = vadd.f32 %v3517_v18, %v3516_v12 }
 0x7ca   : > { %2132 = vrot.lane.b32.xlu1 %v5041_v20, %s4265_s5 }
 0x7ce   : > { %2135 = vrot.lane.b32.xlu1 %v5041_v20, %s4266_s18 }
 0x83a   : > { %v1821_v50 = vpop.xlane.xlu1 %1820 }
 0x83b   : > { %v1822_v54 = vmul.f32 0.03125, %v1821_v50 }
 0x83d   : > { %v5092_v29 = vsub.f32 %v1814_v1, %v1822_v54 }
 0x83e   : > { %v2124_v30 = vpop.permute.xlu1 %2123 }
 0x83f   : > { %v1824_v7 = vmul.f32 %v5092_v29, %v5092_v29  ;;  %v2154_v59 = vcombine.low %v2118_v48, %v2124_v30  ;;  %v2155_v62 = vcombine.high %v2118_v48, %v2124_v30  ;;  %v2491_v30 = vld [vmem:[#allocation6 + $0x20] sm:$0xff] }
 0x841   : > { %v1825_v14 = vsel %vm619_vm0, %v1824_v7, 0.0  ;;  %v2162_v21 = vrot.slane %v2154_v59, %v4698_v55  ;;  %v2169_v38 = vrot.slane %v2155_v62, %v4698_v55  ;;  %v2492_v7 = vld [vmem:[#allocation6 + $0x28] sm:$0xff]  ;;  %v2493_v59 = vld [vmem:[#allocation6 + $0x30] sm:$0xff] }
 0x842   : > { %1826 = vadd.xlane.f32.xlu1 %v1825_v14  ;;  %v2127_v22 = vpop.permute.xlu1 %2126  ;;  %v3979_v48 = vpack.c.bf16 %v2492_v7, %v2491_v30 }
 0x843   : > { %v2202_v44 = vcombine.low %v2146_v37, %v2162_v21  ;;  %v2203_v56 = vcombine.high %v2146_v37, %v2162_v21  ;;  %v2218_v15 = vcombine.low %v2153_v42, %v2169_v38  ;;  %v2219_v33 = vcombine.high %v2153_v42, %v2169_v38  ;;  %v3255_v42 = vld [vmem:[%s5330_s11 + $0x1] ss:$0 sm:$0xff] }
 0x844   : > { %3980 = vmatpush3.bf16.msra.mxu0 %v3979_v48 }
 0x845   : > { %v2210_v2 = vrot.slane %v2202_v44, %v4706_v13  ;;  %v2217_v51 = vrot.slane %v2203_v56, %v4706_v13  ;;  %v2226_v61 = vrot.slane %v2218_v15, %v4706_v13  ;;  %v2233_v50 = vrot.slane %v2219_v33, %v4706_v13  ;;  %3981 = vmatprep.subr.bf16.mxu0 %v4267_v34 }
 0x846   : > { %v2130_v32 = vpop.permute.xlu1 %2129 }
 0x84a   : > { %v2133_v11 = vpop.permute.xlu1 %2132 }
 0x84b   : > { %v2170_v28 = vcombine.low %v2127_v22, %v2133_v11  ;;  %v2171_v31 = vcombine.high %v2127_v22, %v2133_v11  ;;  %v3982_v11 = vpack.c.bf16 %v2494_v6, %v2493_v59 }
 0x84d   : > { %v2178_v45 = vrot.slane %v2170_v28, %v4698_v55  ;;  %v2185_v47 = vrot.slane %v2171_v31, %v4698_v55  ;;  %3983 = vmatpush3.bf16.msra.mxu0 %v3982_v11 }
 0x84e   : > { %v2136_v25 = vpop.permute.xlu1 %2135 }
 0x84f   : > { %v2186_v40 = vcombine.low %v2130_v32, %v2136_v25  ;;  %v2187_v41 = vcombine.high %v2130_v32, %v2136_v25 }
 0x851   : > { %v2194_v49 = vrot.slane %v2186_v40, %v4698_v55  ;;  %v2201_v52 = vrot.slane %v2187_v41, %v4698_v55 }
 0x853   : > { %v2234_v19 = vcombine.low %v2178_v45, %v2194_v49  ;;  %v2235_v57 = vcombine.high %v2178_v45, %v2194_v49  ;;  %v2250_v60 = vcombine.low %v2185_v47, %v2201_v52  ;;  %v2251_v63 = vcombine.high %v2185_v47, %v2201_v52  ;;  %v3256_v45 = vld [vmem:[%s5331_s12 + $0x1] ss:$0 sm:$0xff] }
 0x855   : > { %v2242_v53 = vrot.slane %v2234_v19, %v4706_v13  ;;  %v2249_v3 = vrot.slane %v2235_v57, %v4706_v13  ;;  %v2258_v24 = vrot.slane %v2250_v60, %v4706_v13  ;;  %v2265_v1 = vrot.slane %v2251_v63, %v4706_v13 }
 0x857   : > { %v2267_v43 = vcombine.high %v2210_v2, %v2242_v53  ;;  %v2266_v46 = vcombine.low %v2210_v2, %v2242_v53  ;;  %v2268_v18 = vcombine.low %v2217_v51, %v2249_v3  ;;  %v2271_v39 = vcombine.high %v2226_v61, %v2258_v24 }
 0x858   : > { %v2269_v54 = vcombine.high %v2217_v51, %v2249_v3  ;;  %v2273_v32 = vcombine.high %v2233_v50, %v2265_v1  ;;  %v2270_v21 = vcombine.low %v2226_v61, %v2258_v24  ;;  %v2272_v31 = vcombine.low %v2233_v50, %v2265_v1 }
 0x859   : > { %v2277_v9 = vsel %vm1077_vm2, %v2267_v43, -inf  ;;  %v2274_v12 = vsel %vm1077_vm2, %v2266_v46, -inf  ;;  %v2280_v14 = vsel %vm1077_vm2, %v2268_v18, -inf  ;;  %v2289_v22 = vsel %vm1077_vm2, %v2271_v39, -inf }
 0x85a   : > { %2278 = vmax.xlane.f32.xlu1 %v2277_v9  ;;  %2275 = vmax.xlane.f32.xlu0 %v2274_v12  ;;  %v2283_v62 = vsel %vm1077_vm2, %v2269_v54, -inf  ;;  %v2295_v23 = vsel %vm1077_vm2, %v2273_v32, -inf  ;;  %v2286_v28 = vsel %vm1077_vm2, %v2270_v21, -inf  ;;  %v2292_v37 = vsel %vm1077_vm2, %v2272_v31, -inf }
 0x85e   : > { %2281 = vmax.xlane.f32.xlu1 %v2280_v14  ;;  %2290 = vmax.xlane.f32.xlu0 %v2289_v22 }
 0x862   : > { %2284 = vmax.xlane.f32.xlu1 %v2283_v62  ;;  %2296 = vmax.xlane.f32.xlu0 %v2295_v23 }
 0x866   : > { %2287 = vmax.xlane.f32.xlu1 %v2286_v28 }
 0x86a   : > { %2293 = vmax.xlane.f32.xlu1 %v2292_v37 }
 0x8cf   : > { %v1827_v25 = vpop.xlane.xlu1 %1826 }
 0x8d0   : > { %v1828_v38 = vmul.f32 0.03125, %v1827_v25 }
 0x8d2   : > { %v1829_v40 = vadd.f32 1e-05, %v1828_v38 }
 0x8d4   : > { %4111 = vrsqrt.f32 %v1829_v40 }
 0x8de   : > { %v4112_v41 = vpop.eup %4111 }
 0x8df   : > { %v1831_v44 = vmul.f32 %v4112_v41, %v5092_v29 }
 0x8e1   : > { %v1838_v47 = vmul.f32 %v3255_v42, %v1831_v44 }
 0x8e3   : > { %v5131_v49 = vadd.f32 %v3256_v45, %v1838_v47 }
 0x8e5   : > { %3680 = vmatmul.mubr.msk.f32.vlgmr.msra.gmra.mrb[16].mxu0 %vm619_vm0, %v5131_v49 }
 0x8e7   : > { %v2279_v52 = vpop.xlane.xlu1 %2278  ;;  %v2276_v56 = vpop.xlane.xlu0 %2275 }
 0x8eb   : > { %v2282_v15 = vpop.xlane.xlu1 %2281  ;;  %v2291_v19 = vpop.xlane.xlu0 %2290 }
 0x8ec   : > { %v2299_v29 = vmax.f32 %v2279_v52, %v2291_v19 }
 0x8ef   : > { %v2285_v57 = vpop.xlane.xlu1 %2284  ;;  %v2297_v63 = vpop.xlane.xlu0 %2296 }
 0x8f0   : > { %v2301_v3 = vmax.f32 %v2285_v57, %v2297_v63 }
 0x8f3   : > { %v2288_v60 = vpop.xlane.xlu1 %2287 }
 0x8f4   : > { %v2298_v2 = vmax.f32 %v2276_v56, %v2288_v60 }
 0x8f6   : > { %v2302_v33 = vmax.f32 %v2298_v2, %v2299_v29 }
 0x8f7   : > { %v2294_v53 = vpop.xlane.xlu1 %2293 }
 0x8f8   : > { %v2300_v24 = vmax.f32 %v2282_v15, %v2294_v53 }
 0x8fa   : > { %v2303_v43 = vmax.f32 %v2300_v24, %v2301_v3 }
 0x8fc   : > { %v2304_v46 = vmax.f32 %v2302_v33, %v2303_v43 }
 0x8fe   : > { %v2309_v51 = vsel %vm1111_vm3, %v2288_v60, %v2304_v46  ;;  %v2310_v61 = vsel %vm1111_vm3, %v2291_v19, %v2304_v46  ;;  %v2311_v1 = vsel %vm1111_vm3, %v2294_v53, %v2304_v46  ;;  %v2312_v9 = vsel %vm1111_vm3, %v2297_v63, %v2304_v46 }
 0x8ff   : > { %v2345_v12 = vcombine.low %v2309_v51, %v2311_v1  ;;  %v2346_v18 = vcombine.high %v2309_v51, %v2311_v1  ;;  %v2361_v39 = vcombine.low %v2310_v61, %v2312_v9  ;;  %v2362_v50 = vcombine.high %v2310_v61, %v2312_v9 }
 0x900   : > { %v2305_v54 = vsel %vm1111_vm3, %v2276_v56, %v2304_v46  ;;  %v2306_v30 = vsel %vm1111_vm3, %v2279_v52, %v2304_v46  ;;  %v2307_v7 = vsel %vm1111_vm3, %v2282_v15, %v2304_v46  ;;  %v2308_v14 = vsel %vm1111_vm3, %v2285_v57, %v2304_v46 }
 0x901   : > { %v2353_v22 = vrot.slane %v2345_v12, %v4698_v55  ;;  %v2360_v32 = vrot.slane %v2346_v18, %v4698_v55  ;;  %v2369_v48 = vrot.slane %v2361_v39, %v4698_v55  ;;  %v2376_v59 = vrot.slane %v2362_v50, %v4698_v55 }
 0x902   : > { %v2313_v6 = vcombine.low %v2305_v54, %v2307_v7  ;;  %v2329_v11 = vcombine.low %v2306_v30, %v2308_v14  ;;  %v2314_v62 = vcombine.high %v2305_v54, %v2307_v7  ;;  %v2330_v23 = vcombine.high %v2306_v30, %v2308_v14 }
 0x903   : > { %v2409_v21 = vcombine.low %v2353_v22, %v2369_v48  ;;  %v2410_v28 = vcombine.high %v2353_v22, %v2369_v48  ;;  %v2425_v38 = vcombine.low %v2360_v32, %v2376_v59  ;;  %v2426_v56 = vcombine.high %v2360_v32, %v2376_v59 }
 0x904   : > { %v2321_v31 = vrot.slane %v2313_v6, %v4698_v55  ;;  %v2337_v37 = vrot.slane %v2329_v11, %v4698_v55  ;;  %v2328_v58 = vrot.slane %v2314_v62, %v4698_v55  ;;  %v2344_v25 = vrot.slane %v2330_v23, %v4698_v55 }
 0x905   : > { %v2424_v40 = vrot.slane %v2410_v28, %v4706_v13  ;;  %v2417_v44 = vrot.slane %v2409_v21, %v4706_v13  ;;  %v2433_v15 = vrot.slane %v2425_v38, %v4706_v13  ;;  %v2440_v3 = vrot.slane %v2426_v56, %v4706_v13 }
 0x906   : > { %v2378_v41 = vcombine.high %v2321_v31, %v2337_v37  ;;  %v2377_v42 = vcombine.low %v2321_v31, %v2337_v37  ;;  %v2393_v45 = vcombine.low %v2328_v58, %v2344_v25  ;;  %v2394_v55 = vcombine.high %v2328_v58, %v2344_v25  ;;  %v3292_v37 = vld [vmem:[%s5326_s7 + $0x1] ss:$0 sm:$0xff] }
 0x907   : > { %v2484_v30 = vsub.f32 %v5041_v20, %v5086_v35 }
 0x908   : > { %v2392_v47 = vrot.slane %v2378_v41, %v4706_v13  ;;  %v2385_v52 = vrot.slane %v2377_v42, %v4706_v13  ;;  %v2401_v60 = vrot.slane %v2393_v45, %v4706_v13  ;;  %v2408_v29 = vrot.slane %v2394_v55, %v4706_v13 }
 0x90a   : > { %v2443_v19 = vcombine.low %v2392_v47, %v2424_v40  ;;  %v2442_v57 = vcombine.high %v2385_v52, %v2417_v44  ;;  %v2441_v63 = vcombine.low %v2385_v52, %v2417_v44  ;;  %v2446_v2 = vcombine.high %v2401_v60, %v2433_v15 }
 0x90b   : > { %v2444_v53 = vcombine.high %v2392_v47, %v2424_v40  ;;  %v2448_v24 = vcombine.high %v2408_v29, %v2440_v3  ;;  %v2445_v33 = vcombine.low %v2401_v60, %v2433_v15  ;;  %v2447_v43 = vcombine.low %v2408_v29, %v2440_v3 }
 0x90c   : > { %2454 = vrot.lane.b32.xlu0 %v2443_v19, %s4265_s5  ;;  %2450 = vrot.lane.b32.xlu1 %v2442_v57, %s4266_s18 }
 0x910   : > { %2466 = vrot.lane.b32.xlu0 %v2446_v2, %s4262_s20  ;;  %2458 = vrot.lane.b32.xlu1 %v2444_v53, %s4264_s16  ;;  %s5364_s20 = sld [smem:[#allocation15_spill]] }
 0x914   : > { %2474 = vrot.lane.b32.xlu0 %v2448_v24, %s4261_s22  ;;  %2462 = vrot.lane.b32.xlu1 %v2445_v33, %s4263_s17 }
 0x918   : > { %2470 = vrot.lane.b32.xlu1 %v2447_v43, %s4260_s28  ;;  %s5366_s28 = sld [smem:[#allocation17_spill]] }
 0x91e   : > { %s573_s22 = scalar_lea.vmem %s5366_s28, %s5369_s24 }
 0x97e   : > { %v2451_v46 = vpop.permute.xlu1 %2450  ;;  %v2455_v51 = vpop.permute.xlu0 %2454 }
 0x97f   : > { %v2477_v61 = vsel %vm1077_vm2, %v2441_v63, %v2451_v46 }
 0x980   : > { %v2478_v13 = vsel %vm619_vm0, %v2477_v61, %v2455_v51 }
 0x982   : > { %v2459_v1 = vpop.permute.xlu1 %2458  ;;  %v2467_v9 = vpop.permute.xlu0 %2466 }
 0x983   : > { %v2479_v12 = vsel %vm1286_vm4, %v2478_v13, %v2459_v1 }
 0x986   : > { %v2463_v18 = vpop.permute.xlu1 %2462  ;;  %v2475_v7 = vpop.permute.xlu0 %2474 }
 0x987   : > { %v2480_v39 = vsel %vm1288_vm5, %v2479_v12, %v2463_v18  ;;  %v3304_v18 = vld [vmem:[%s5328_s9 + $0x80] sm:$0xff] }
 0x988   : > { %v2481_v54 = vsel %vm1290_vm6, %v2480_v39, %v2467_v9 }
 0x98a   : > { %v2471_v50 = vpop.permute.xlu1 %2470 }
 0x98b   : > { %v2482_v14 = vsel %vm1292_vm7, %v2481_v54, %v2471_v50  ;;  %v3308_v54 = vld [vmem:[%s5328_s9 + $0xa0] sm:$0xff] }
 0x98c   : > { %v2483_v22 = vsel %vm1294_vm8, %v2482_v14, %v2475_v7  ;;  %v3310_v14 = vld [vmem:[%s5328_s9 + $0xb0] sm:$0xff] }
 0x98d   : > { %v2485_v32 = vsub.f32 %v2484_v30, %v2483_v22  ;;  %v3309_v30 = vld [vmem:[%s5328_s9 + $0xa8] sm:$0xff] }
 0x98e   : > { %v4015_v7 = vpack.c.bf16 %v3309_v30, %v3308_v54 }
 0x98f   : > { %v2486_v48 = vmul.f32 1.442695, %v2485_v32  ;;  %v3312_v32 = vld [vmem:[%s5328_s9 + $0xc0] sm:$0xff] }
 0x991   : > { %4113 = vpow2.f32 %v2486_v48  ;;  %v3313_v48 = vld [vmem:[%s5328_s9 + $0xc8] sm:$0xff] }
 0x99b   : > { %v4114_v59 = vpop.eup %4113 }
 0x99c   : > { %v2488_v6 = vadd.f32 1e-06, %v4114_v59  ;;  %v4021_v59 = vpack.c.bf16 %v3313_v48, %v3312_v32 }
 0x99e   : > { %v5183_v11 = vmul.f32 0.25, %v2488_v6  ;;  %v3314_v6 = vld [vmem:[%s5328_s9 + $0xd0] sm:$0xff] }
 0x9a0   : > { %2577 = vrot.lane.b32.xlu1 %v5183_v11, %s4263_s17  ;;  %v2821_v62 = vsel %vm1632_vm9, %v5183_v11, 0.0 }
 0x9a1   : > { %v2822_v23 = vrot.slane %v2821_v62, 4 }
 0x9a3   : > { %v2823_v20 = vadd.f32 %v2822_v23, %v2821_v62  ;;  %v3316_v23 = vld [vmem:[%s5328_s9 + $0xe0] sm:$0xff] }
 0x9a5   : > { %v2824_v35 = vrot.slane %v2823_v20, 2 }
 0x9a7   : > { %v2825_v21 = vadd.f32 %v2824_v35, %v2823_v20  ;;  %v3317_v20 = vld [vmem:[%s5328_s9 + $0xe8] sm:$0xff] }
 0x9a8   : > { %v4027_v35 = vpack.c.bf16 %v3317_v20, %v3316_v23 }
 0x9a9   : > { %v2826_v28 = vrot.slane %v2825_v21, 1 }
 0x9ab   : > { %v2827_v31 = vadd.f32 %v2826_v28, %v2825_v21  ;;  %v3318_v21 = vld [vmem:[%s5328_s9 + $0xf0] sm:$0xff]  ;;  %v3319_v28 = vld [vmem:[%s5328_s9 + $0xf8] sm:$0xff] }
 0x9ad   : > { %2829 = vrot.lane.b32.xlu1 %v2827_v31, %s4263_s17  ;;  %v4030_v31 = vpack.c.bf16 %v3319_v28, %v3318_v21 }
 0x9b8   : > { %v2572_v58 = vpop.f32.mrb[16].mxu0 }
 0x9b9   : > { %v2573_v25 = vadd.f32 %v3292_v37, %v2572_v58  ;;  %v3681_v38 = vpop.f32.mrb[17].mxu0 }
 0x9bb   : > { %3682 = vmatprep.subr.mxu0 %v2573_v25 }
 0x9bc   : > { %3683 = vmatpush3.msra.mxu0 %v2573_v25 }
 0x9bd   : > { %3984 = vmatprep.subr.bf16.mxu0 %v4267_v34 }
 0xa12   : > { %v2578_v40 = vpop.permute.xlu1 %2577 }
 0xa13   : > { %2580 = vxpose.xlu0.b32.start.end [1/1] (short) (narrow) %v2578_v40, 64  ;;  %v3321_v40 = vld [vmem:[%s5329_s10 + $0x1] ss:$0 sm:$0xff] }
 0xa1f   : > { %v2830_v41 = vpop.permute.xlu1 %2829 }
 0xa20   : > { %v2832_v42 = vmul.f32 %v2830_v41, %v5183_v11 }
 0xa22   : > { %3732 = vmatmul.mubr.msk.f32.vlgmr.msra.gmra.mrb[12].mxu1 %vm1288_vm5, %v2832_v42 }
 0xa23   : > { %3777 = vmatprep.mubr.msk.f32.mxu1 %vm4268_vm1, %v4259_v0 }
 0xa93   : > { %v2596_v44 = vpop.trf.xlu0 }
 0xa94   : > { %3684 = vmatprep.mubr.msk.f32.mxu0 %vm1422_vm10, %v2596_v44 }
 0xa97   : > { %v2597_v45 = vpop.trf.xlu0 }
 0xa98   : > { %3685 = vmatmul.mubr.msk.f32.vlgmr.msra.gmra.mrb[18].mxu0 %vm1422_vm10, %v2597_v45 }
 0xa9b   : > { %v2598_v47 = vpop.trf.xlu0 }
 0xa9c   : > { %3687 = vmatprep.mubr.msk.f32.mxu0 %vm1422_vm10, %v2598_v47 }
 0xa9f   : > { %v2599_v52 = vpop.trf.xlu0 }
 0xaa0   : > { %3688 = vmatmul.mubr.msk.f32.gmra.mrb[20].mxu0 %vm1422_vm10, %v2599_v52 }
 0xaa3   : > { %v2600_v56 = vpop.trf.xlu0 }
 0xaa4   : > { %3690 = vmatprep.mubr.msk.f32.mxu0 %vm1422_vm10, %v2600_v56 }
 0xaa7   : > { %v2601_v15 = vpop.trf.xlu0 }
 0xaa8   : > { %3691 = vmatmul.mubr.msk.f32.gmra.mrb[22].mxu0 %vm1422_vm10, %v2601_v15 }
 0xaab   : > { %v2602_v19 = vpop.trf.xlu0 }
 0xaac   : > { %3693 = vmatprep.mubr.msk.f32.mxu0 %vm1422_vm10, %v2602_v19 }
 0xaaf   : > { %v2603_v57 = vpop.trf.xlu0 }
 0xab0   : > { %3694 = vmatmul.mubr.msk.f32.gmra.mrb[24].mxu0 %vm1422_vm10, %v2603_v57 }
 0xab1   : > { %3712 = vmatprep.mubr.msk.f32.mxu0 %vm4268_vm1, %v4259_v0 }
 0xaf5   : > { %v5208_v60 = vpop.f32.mrb[12].mxu1 }
 0xaf6   : > { %v3733_v55 = vpop.f32.mrb[13].mxu1  ;;  %4115 = vrcp.f32 %v5208_v60 }
 0xaf7   : > { %v3036_v55 = vld [vmem:[%s5364_s20] sm:$0xff] }
 0xb00   : > { %v4116_v37 = vpop.eup %4115 }
 0xb6b   : > { %v3686_v63 = vpop.f32.mrb[18].mxu0 }
 0xb6c   : > { %v2742_v2 = vmul.f32 %v3686_v63, %v4806_v5  ;;  %v2702_v53 = vpop.f32.mrb[19].mxu0 }
 0xb6d   : > { %v2741_v29 = vmul.f32 %v2702_v53, %v4804_v4 }
 0xb6f   : > { %v3985_v3 = vpack.c.bf16 %v2742_v2, %v2741_v29  ;;  %v3039_v2 = vld [vmem:[%s5364_s20 + $0x18] sm:$0xff] }
 0xb71   : > { %3986 = vmatpush3.bf16.msra.mxu0 %v3985_v3 }
 0xb72   : > { %3987 = vmatprep.subr.bf16.mxu0 %v4267_v34 }
 0xb73   : > { %v3689_v24 = vpop.f32.mrb[20].mxu0 }
 0xb74   : > { %v2744_v33 = vmul.f32 %v3689_v24, %v4815_v10  ;;  %v2712_v43 = vpop.f32.mrb[21].mxu0 }
 0xb75   : > { %v2743_v46 = vmul.f32 %v2712_v43, %v4813_v8  ;;  %v3324_v43 = vld [vmem:[%s5330_s11 + $0x2] ss:$0 sm:$0xff] }
 0xb77   : > { %v3988_v51 = vpack.c.bf16 %v2744_v33, %v2743_v46  ;;  %v3325_v46 = vld [vmem:[%s5331_s12 + $0x2] ss:$0 sm:$0xff] }
 0xb79   : > { %3989 = vmatpush3.bf16.msra.mxu0 %v3988_v51 }
 0xb7a   : > { %3990 = vmatprep.subr.bf16.mxu0 %v4267_v34 }
 0xb7b   : > { %v3692_v61 = vpop.f32.mrb[22].mxu0 }
 0xb7c   : > { %v2746_v5 = vmul.f32 %v3692_v61, %v4826_v17  ;;  %v2722_v1 = vpop.f32.mrb[23].mxu0  ;;  %v3305_v17 = vld [vmem:[%s5328_s9 + $0x88] sm:$0xff] }
 0xb7d   : > { %v2745_v4 = vmul.f32 %v2722_v1, %v4824_v16  ;;  %v4009_v16 = vpack.c.bf16 %v3305_v17, %v3304_v18 }
 0xb7f   : > { %v3991_v9 = vpack.c.bf16 %v2746_v5, %v2745_v4  ;;  %v3326_v5 = vld [vmem:[%s5365_s25] ss:$0 sm:$0xff] }
 0xb81   : > { %3992 = vmatpush3.bf16.msra.mxu0 %v3991_v9 }
 0xb82   : > { %3993 = vmatprep.subr.bf16.mxu0 %v4267_v34 }
 0xb83   : > { %v3695_v13 = vpop.f32.mrb[24].mxu0 }
 0xb84   : > { %v2748_v10 = vmul.f32 %v3695_v13, %v4837_v27  ;;  %v2732_v12 = vpop.f32.mrb[25].mxu0  ;;  %v3306_v27 = vld [vmem:[%s5328_s9 + $0x90] sm:$0xff] }
 0xb85   : > { %v2747_v8 = vmul.f32 %v2732_v12, %v4835_v26  ;;  %v3307_v26 = vld [vmem:[%s5328_s9 + $0x98] sm:$0xff] }
 0xb86   : > { %v4012_v50 = vpack.c.bf16 %v3307_v26, %v3306_v27 }
 0xb87   : > { %v3994_v39 = vpack.c.bf16 %v2748_v10, %v2747_v8 }
 0xb89   : > { %3995 = vmatpush3.bf16.msra.mxu0 %v3994_v39 }
 0xb8a   : > { %4008 = vmatprep.subr.bf16.mxu0 %v4267_v34 }
 0xb8c   : > { %3713 = vmatmul.mubr.msk.f32.vlgmr.msra.gmra.mrb[26].mxu0 %vm1288_vm5, %v5183_v11  ;;  %v3315_v11 = vld [vmem:[%s5328_s9 + $0xd8] sm:$0xff] }
 0xb8d   : > { %4010 = vmatpush3.bf16.msra.mxu0 %v4009_v16  ;;  %3766 = vmatprep.mubr.msk.f32.mxu0 %vm4268_vm1, %v4259_v0  ;;  %v3311_v0 = vld [vmem:[%s5328_s9 + $0xb8] sm:$0xff]  ;;  %v4024_v62 = vpack.c.bf16 %v3315_v11, %v3314_v6 }
 0xb8e   : > { %4011 = vmatprep.subr.bf16.mxu0 %v4267_v34  ;;  %v4018_v22 = vpack.c.bf16 %v3311_v0, %v3310_v14 }
 0xb91   : > { %4013 = vmatpush3.bf16.msra.mxu0 %v4012_v50 }
 0xb92   : > { %4014 = vmatprep.subr.bf16.mxu0 %v4267_v34 }
 0xb95   : > { %4016 = vmatpush3.bf16.msra.mxu0 %v4015_v7 }
 0xb96   : > { %4017 = vmatprep.subr.bf16.mxu0 %v4267_v34 }
 0xb99   : > { %4019 = vmatpush3.bf16.msra.mxu0 %v4018_v22 }
 0xb9a   : > { %4020 = vmatprep.subr.bf16.mxu0 %v4267_v34 }
 0xb9d   : > { %4022 = vmatpush3.bf16.msra.mxu0 %v4021_v59 }
 0xb9e   : > { %4023 = vmatprep.subr.bf16.mxu0 %v4267_v34 }
 0xba1   : > { %4025 = vmatpush3.bf16.msra.mxu0 %v4024_v62 }
 0xba2   : > { %4026 = vmatprep.subr.bf16.mxu0 %v4267_v34 }
 0xba5   : > { %4028 = vmatpush3.bf16.msra.mxu0 %v4027_v35 }
 0xba6   : > { %4029 = vmatprep.subr.bf16.mxu0 %v4267_v34 }
 0xba9   : > { %4031 = vmatpush3.bf16.msra.mxu0 %v4030_v31 }
 0xc5f   : > { %v2817_v58 = vpop.f32.mrb[26].mxu0 }
 0xc60   : > { %v2907_v25 = vmul.f32 %v4116_v37, %v2817_v58  ;;  %v3714_v38 = vpop.f32.mrb[27].mxu0 }
 0xc62   : > { %3767 = vmatmul.mubr.f32.vlgmr.msra.gmra.mrb[28].mxu0 %v2907_v25 }
 0xd35   : > { %v2999_v41 = vpop.f32.mrb[28].mxu0 }
 0xd36   : > { %v3000_v42 = vadd.f32 %v3321_v40, %v2999_v41  ;;  %v3768_v44 = vpop.f32.mrb[29].mxu0 }
 0xd38   : > { %v3003_v45 = vadd.f32 %v3000_v42, %v5074_v36  ;;  %v3037_v36 = vld [vmem:[%s5364_s20 + $0x8] sm:$0xff] }
 0xd39   : > { %v4033_v63 = vpack.c.bf16 %v3037_v36, %v3036_v55 }
 0xd3a   : > { %v3004_v47 = vadd.f32 %v3003_v45, %v5131_v49  ;;  %v3038_v49 = vld [vmem:[%s5364_s20 + $0x10] sm:$0xff] }
 0xd3b   : > { %4034 = vmatpush3.bf16.msra.mxu1 %v4033_v63  ;;  %v4036_v53 = vpack.c.bf16 %v3039_v2, %v3038_v49 }
 0xd3c   : > { %v3009_v52 = vsel %vm619_vm0, %v3004_v47, 0.0  ;;  %4035 = vmatprep.subr.bf16.mxu1 %v4267_v34 }
 0xd3d   : > { %3010 = vadd.xlane.f32.xlu1 %v3009_v52 }
 0xd3f   : > { %4037 = vmatpush3.bf16.msra.mxu1 %v4036_v53 }
 0xdca   : > { %v3011_v56 = vpop.xlane.xlu1 %3010 }
 0xdcb   : > { %v3012_v15 = vmul.f32 0.03125, %v3011_v56 }
 0xdcd   : > { %v3013_v19 = vsub.f32 %v3004_v47, %v3012_v15 }
 0xdcf   : > { %v3014_v57 = vmul.f32 %v3013_v19, %v3013_v19 }
 0xdd1   : > { %v3015_v60 = vsel %vm619_vm0, %v3014_v57, 0.0 }
 0xdd2   : > { %3016 = vadd.xlane.f32.xlu0 %v3015_v60 }
 0xe5f   : > { %v3017_v29 = vpop.xlane.xlu0 %3016 }
 0xe60   : > { %v3018_v3 = vmul.f32 0.03125, %v3017_v29 }
 0xe62   : > { %v3019_v24 = vadd.f32 1e-05, %v3018_v3 }
 0xe64   : > { %4117 = vrsqrt.f32 %v3019_v24 }
 0xe6e   : > { %v4118_v33 = vpop.eup %4117 }
 0xe6f   : > { %v3021_v34 = vmul.f32 %v4118_v33, %v3013_v19 }
 0xe71   : > { %v3028_v51 = vmul.f32 %v3324_v43, %v3021_v34 }
 0xe73   : > { %v3035_v61 = vadd.f32 %v3325_v46, %v3028_v51 }
 0xe75   : > { %3778 = vmatmul.mubr.msk.f32.vlgmr.msra.gmra.mrb[14].mxu1 %vm619_vm0, %v3035_v61 }
 0xf48   : > { %v3116_v1 = vpop.f32.mrb[14].mxu1 }
 0xf49   : > { %v3117_v4 = vadd.f32 %v3326_v5, %v3116_v1  ;;  %v3779_v9 = vpop.f32.mrb[15].mxu1 }
 0xf4b   : > { %v3120_v13 = vmax.f32 %v3117_v4, 0.0 }
 0xf4d   : > { %v3122_v10 = vsel %vm3121_vm11, %v3120_v13, 0.0 }
 0xf4e   : > { %3123 = vadd.xlane.f32.xlu1 %v3122_v10 }
 0xfdb   : > { %v3124_v12 = vpop.xlane.xlu1 %3123 }
 0xfdc   : > { %v3125_v8 = vrot.slane %v3124_v12, 4 }
 0xfde   : > { %v3126_v18 = vadd.f32 %v3125_v8, %v3124_v12 }
 0xfe0   : > { %v3127_v17 = vrot.slane %v3126_v18, 2 }
 0xfe2   : > { %v3128_v39 = vadd.f32 %v3127_v17, %v3126_v18 }
 0xfe4   : > { %v3129_v16 = vrot.slane %v3128_v39, 1 }
 0xfe6   : > { %v3130_v27 = vadd.f32 %v3129_v16, %v3128_v39 }
 0xfe8   : > { %4038 = vpush %v3130_v27 }
0x1019   : > { %s4039_s17 = spop %4038 }
0x101a   : > { %v3132_v26 = vstv %s4039_s17 }
0x101b   : > { %3134 = vst [vmem:[%s573_s22] sm:$0x1] %v3132_v26 }
0x101c PF: > { %s5367_s16 = sld [smem:[#allocation12_spill]] }
0x1022   : > { %s29_s21 = sadd.s32 1, %s5367_s16  }
0x1023   : > { %p26_p1 = scmp.ge.s32.totalorder %s29_s21, 4  }
0x1025   :  { %28 = sbr.rel (!%p26_p1) target bundleno = 9 (0x9), region = 142 }
0x102c   :  { %3152 = vsyncpa [#allocation3], 1 }
0x102d   :  { %3154 = vsyncpa [#allocation3 + $0x1], 1 }
0x102e   :  { %3155 = vsyncpa [#allocation5], 1 }
0x102f   :  { %3156 = vsyncpa [#allocation8], 1 }

</bundles_post_ra>
